<compile_context>
chip_gen: v6e
topology: v6e:2x2x1
jax: 0.10.0
libtpu: 0.0.40
codegen_flags: <defaults>
</compile_context>

<pallas_src>
import functools
import math

import numpy as np
import jax
import jax.numpy as jnp
from jax import lax
from jax.experimental import pallas as pl
from jax.experimental.pallas import tpu as pltpu


def _soft_unit_step(x):
    # e3nn.math.soft_unit_step: exp(-1/x) for x > 0, else 0
    x_safe = jnp.where(x > 0.0, x, 1.0)
    return jnp.where(x > 0.0, jnp.exp(-1.0 / x_safe), 0.0)


def _one_hot(cond, dtype):
    # select in f32 (v5e VPU has no bf16), then cast; 0/1 are exact in bf16.
    return jnp.where(cond, 1.0, 0.0).astype(dtype)


def se3_transformer_kernel(
    src_row_ref, dst_row_ref, dst_col_ref, pos_t_ref, f_in_t_ref,
    w1_kv_t_ref, w_kv_t_ref, wq_dot_t_ref, wsi_t_ref, gamma_ref, beta_ref,
    out_ref, z_acc, g_acc,
    *, radius, num_basis, c_attn, n_nodes, eps,
):
    f32 = jnp.float32
    bf16 = jnp.bfloat16
    te = src_row_ref.shape[1]          # edges per tile (lane dimension)

    @pl.when(pl.program_id(0) == 0)
    def _init():
        z_acc[...] = jnp.zeros_like(z_acc)
        g_acc[...] = jnp.zeros_like(g_acc)

    # ---- per-tile one-hot incidence rebuilt in VMEM from int32 edge ids ----
    # Padded edges have id == n_nodes -> all-zero one-hots -> inert everywhere.
    src_ids = src_row_ref[...]                              # [1, TE] int32
    dst_ids = dst_row_ref[...]                              # [1, TE] int32
    dst_ids_col = dst_col_ref[...]                          # [TE, 1] int32
    iota_ne = lax.broadcasted_iota(jnp.int32, (n_nodes, te), 0)
    iota_en = lax.broadcasted_iota(jnp.int32, (te, n_nodes), 1)
    src_oh_f = jnp.where(iota_ne == src_ids, 1.0, 0.0)      # [N, TE] f32
    dst_oh_f = jnp.where(iota_ne == dst_ids, 1.0, 0.0)      # [N, TE] f32
    src_oh_b = src_oh_f.astype(bf16)
    dst_oh_b = dst_oh_f.astype(bf16)
    diff_b = (dst_oh_f - src_oh_f).astype(bf16)             # dst - src, values in {-1,0,1}
    dst_oh_et = _one_hot(iota_en == dst_ids_col, f32)       # [TE, N] f32 (scatter side)

    pos_t_b = pos_t_ref[...].astype(bf16)                   # [3, N]
    f_in_t = f_in_t_ref[...]                                 # [C_IN, N] f32
    f_in_t_b = f_in_t.astype(bf16)

    # ---- radius-graph geometry, E on lanes ----
    edge_vec_t = jnp.dot(pos_t_b, diff_b, preferred_element_type=f32)          # [3, TE]
    d = jnp.sqrt(jnp.sum(edge_vec_t * edge_vec_t, axis=0, keepdims=True))      # [1, TE]
    valid = (d <= radius).astype(f32)
    # TODO(synk): torch_cluster.radius_graph additionally caps max_num_neighbors
    # (default 32); the mask keeps all edges with d <= radius.

    # Spherical harmonics: with pure 0e irreps only the l=0 component (==const)
    # enters any tensor-product path, so it is folded into the weights.
    # TODO(synk): l=1,2 SH paths need Clebsch-Gordan tables; unused here.

    # ---- soft_one_hot_linspace(d, 0, radius, B, 'smooth_finite', cutoff=True) ----
    # (basis constant 1.14136*e^2*sqrt(B) folded into w1_kv host-side)
    step = radius / (num_basis + 1)
    centers = (lax.broadcasted_iota(jnp.int32, (num_basis, 1), 0).astype(f32) + 1.0) * step
    u = (d - centers) * (1.0 / step)                                           # [B, TE]
    emb = _soft_unit_step(u + 1.0) * _soft_unit_step(1.0 - u)

    # edge_weight_cutoff = soft_unit_step(10 * (1 - d / radius))
    cutoff = _soft_unit_step(10.0 * (1.0 - d * (1.0 / radius)))                # [1, TE]

    # ---- fused radial MLPs (mlp_k || mlp_v): one matmul + one relu ----
    h_kv_t = jnp.maximum(
        jnp.dot(w1_kv_t_ref[...], emb, preferred_element_type=f32), 0.0)       # [2H, TE]

    # ---- FullyConnectedTensorProduct (0e x 0e -> 0e), per-edge weights ----
    # kv[o,e] = sum_{h,c} W[o, h*C_IN+c] * h_kv[h,e] * f_src[c,e]
    f_src_t = jnp.dot(f_in_t_b, src_oh_b, preferred_element_type=f32)          # [C_IN, TE]
    two_h = h_kv_t.shape[0]
    c_in = f_src_t.shape[0]
    g_t = (h_kv_t[:, None, :] * f_src_t[None, :, :]).reshape(two_h * c_in, te) # [2H*C_IN, TE]
    kv_t = jnp.dot(w_kv_t_ref[...], g_t, preferred_element_type=f32)           # [Ca+Co, TE]
    k_t = kv_t[:c_attn, :]                                                     # [C_ATTN, TE]
    v_t = kv_t[c_attn:, :]                                                     # [C_OUT, TE]

    # ---- attention logits (w_dot and all scalings folded into wq_dot) ----
    f_dst_t = jnp.dot(f_in_t_b, dst_oh_b, preferred_element_type=f32)          # [C_IN, TE]
    q_t = jnp.dot(wq_dot_t_ref[...], f_dst_t, preferred_element_type=f32)      # [C_ATTN, TE]
    logit = jnp.sum(q_t * k_t, axis=0, keepdims=True)                          # [1, TE]

    # ---- single-pass scatter softmax ----
    # Reference subtracts a global max that cancels exactly in alpha; a clamp
    # gives the same overflow safety without a cross-tile XLU reduce.
    expv = valid * cutoff * jnp.exp(jnp.minimum(logit, 60.0))                  # [1, TE]
    w_edge = jnp.sqrt(expv)   # alpha.relu().sqrt()*v == (sqrt(expv)*v)/sqrt(z[dst])
    z_acc[...] += jnp.dot(expv, dst_oh_et, preferred_element_type=f32)         # [1, N]
    g_acc[...] += jnp.dot(w_edge * v_t, dst_oh_et, preferred_element_type=f32) # [C_OUT, N]

    # ---- finalize on the last edge tile ----
    @pl.when(pl.program_id(0) == pl.num_programs(0) - 1)
    def _finalize():
        z = z_acc[...]                                                         # [1, N]
        inv_sqrt_z = lax.rsqrt(jnp.where(z <= 0.0, 1.0, z))                    # z[z == 0] = 1
        f_agg_t = g_acc[...] * inv_sqrt_z                                      # [C_OUT, N]
        # self interaction (o3.Linear on 0e)
        f_out_t = f_agg_t + jnp.dot(wsi_t_ref[...], f_in_t, preferred_element_type=f32)
        # e3nn BatchNorm (scalar irreps, training-mode batch statistics)
        # TODO(synk): running-stats/momentum update not reproduced (forward-only).
        mean = jnp.mean(f_out_t, axis=1, keepdims=True)
        cent = f_out_t - mean
        var = jnp.mean(cent * cent, axis=1, keepdims=True)
        out_ref[...] = (cent * lax.rsqrt(var + eps) * gamma_ref[...]
                        + beta_ref[...]).astype(out_ref.dtype)


def init_params(key, *, c_in, c_out, c_attn, num_basis, hidden):
    # e3nn initializes all weights ~ N(0, 1); normalization constants are folded in host-side.
    ks = jax.random.split(key, 7)
    return {
        "w_q":   jax.random.normal(ks[0], (c_in, c_attn), jnp.float32),
        "w_k1":  jax.random.normal(ks[1], (num_basis, hidden), jnp.float32),
        "w_k2":  jax.random.normal(ks[2], (hidden, c_in * c_attn), jnp.float32),
        "w_v1":  jax.random.normal(ks[3], (num_basis, hidden), jnp.float32),
        "w_v2":  jax.random.normal(ks[4], (hidden, c_in * c_out), jnp.float32),
        "w_dot": jax.random.normal(ks[5], (c_attn, c_attn), jnp.float32),
        "w_si":  jax.random.normal(ks[6], (c_in, c_out), jnp.float32),
        "gamma": jnp.ones((1, c_out), jnp.float32),
        "beta":  jnp.zeros((1, c_out), jnp.float32),
    }


def se3_transformer_forward(pos, f_in, params, *, radius, num_basis, edge_tile=128):
    n = pos.shape[0]
    c_in = f_in.shape[1]
    c_attn = params["w_q"].shape[1]
    c_out = params["w_si"].shape[1]
    hidden = params["w_k1"].shape[1]
    act_gain = math.sqrt(2.0)   # e3nn normalize2mom gain for relu

    # ---------- host-side constant folding / weight fusion (unchanged numerics) ----------
    # Fused first MLP layer: [w_k1 | w_v1]^T @ emb; folds the smooth_finite basis
    # constant (1.14136*e^2*sqrt(B)), the relu gain and 1/sqrt(fan_in=B).
    emb_norm = 1.14136 * math.exp(2.0) * math.sqrt(float(num_basis))
    w1_scale = emb_norm * act_gain / math.sqrt(float(num_basis))
    w1_kv_t = (jnp.concatenate([params["w_k1"], params["w_v1"]], axis=1) * w1_scale).T  # [2H, B]

    # Fused second layer + tensor product weights, contraction index (h*C_IN + c);
    # folds 1/sqrt(H) and 1/sqrt(C_IN).
    scale2 = 1.0 / (math.sqrt(float(hidden)) * math.sqrt(float(c_in)))
    wk2_r = (params["w_k2"] * scale2).reshape(hidden, c_in, c_attn)
    wv2_r = (params["w_v2"] * scale2).reshape(hidden, c_in, c_out)
    w_kv = jnp.zeros((2 * hidden, c_in, c_attn + c_out), jnp.float32)
    w_kv = w_kv.at[:hidden, :, :c_attn].set(wk2_r)
    w_kv = w_kv.at[hidden:, :, c_attn:].set(wv2_r)
    w_kv_t = w_kv.reshape(2 * hidden * c_in, c_attn + c_out).T                 # [Ca+Co, 2H*C_IN]

    # Fold w_dot into w_q; absorb 1/sqrt(C_IN) (h_q) and 1/C_ATTN (dot product).
    wq_dot_t = ((params["w_q"] @ params["w_dot"])
                * (1.0 / (math.sqrt(float(c_in)) * c_attn))).T                 # [C_ATTN, C_IN]
    wsi_t = (params["w_si"] * (1.0 / math.sqrt(float(c_in)))).T                # [C_OUT, C_IN]
    gamma_t = params["gamma"].reshape(c_out, 1)
    beta_t = params["beta"].reshape(c_out, 1)

    pos_t = pos.T          # [3, N]  (E-on-lanes layout: node axis on lanes for node data)
    f_in_t = f_in.T        # [C_IN, N]

    # ---------- edge enumeration: all ordered pairs i != j (loop=False) ----------
    idx = np.arange(n)
    src, dst = np.meshgrid(idx, idx, indexing="ij")
    keep = src != dst
    src = src[keep].astype(np.int32)
    dst = dst[keep].astype(np.int32)
    e = src.shape[0]
    te = int(edge_tile)
    e_pad = max(te, ((e + te - 1) // te) * te)     # lane-aligned (multiple of 128)
    # Padded edges get node id == n -> in-kernel one-hots are all-zero -> inert.
    src_pad = np.full((e_pad,), n, np.int32); src_pad[:e] = src
    dst_pad = np.full((e_pad,), n, np.int32); dst_pad[:e] = dst
    src_row = jnp.asarray(src_pad).reshape(1, e_pad)
    dst_row = jnp.asarray(dst_pad).reshape(1, e_pad)
    dst_col = jnp.asarray(dst_pad).reshape(e_pad, 1)

    num_tiles = e_pad // te

    kernel = functools.partial(
        se3_transformer_kernel,
        radius=float(radius), num_basis=int(num_basis), c_attn=int(c_attn),
        n_nodes=int(n), eps=1e-5)

    const = lambda i: (0, 0)   # weights / node data stay VMEM-resident (no re-DMA per tile)
    grid_spec = pltpu.PrefetchScalarGridSpec(
        num_scalar_prefetch=0,
        grid=(num_tiles,),
        in_specs=[
            pl.BlockSpec((1, te), lambda i: (0, i)),       # edge_src ids  (edge stream)
            pl.BlockSpec((1, te), lambda i: (0, i)),       # edge_dst ids  (edge stream)
            pl.BlockSpec((te, 1), lambda i: (i, 0)),       # edge_dst ids, column layout
            pl.BlockSpec((3, n), const),                   # pos^T
            pl.BlockSpec((c_in, n), const),                # f_in^T
            pl.BlockSpec((2 * hidden, num_basis), const),  # fused mlp_k|mlp_v layer 1
            pl.BlockSpec((c_attn + c_out, 2 * hidden * c_in), const),   # packed TP weights
            pl.BlockSpec((c_attn, c_in), const),           # w_q @ w_dot (folded)
            pl.BlockSpec((c_out, c_in), const),            # self-interaction
            pl.BlockSpec((c_out, 1), const),               # gamma
            pl.BlockSpec((c_out, 1), const),               # beta
        ],
        out_specs=pl.BlockSpec((c_out, n), const),
        scratch_shapes=[pltpu.VMEM((1, n), jnp.float32),        # z accumulator
                        pltpu.VMEM((c_out, n), jnp.float32)],   # sqrt(expv)*v accumulator
    )

    # Per-tile working set is <2 MiB, so default scoped VMEM limits are fine on
    # every generation (incl. v7x's 64 MiB physical VMEM).
    out_t = pl.pallas_call(
        kernel,
        out_shape=jax.ShapeDtypeStruct((c_out, n), jnp.float32),
        grid_spec=grid_spec,
        compiler_params=pltpu.CompilerParams(
            dimension_semantics=("arbitrary",)),   # E axis carries the scatter accumulators
    )(src_row, dst_row, dst_col, pos_t, f_in_t,
      w1_kv_t, w_kv_t, wq_dot_t, wsi_t, gamma_t, beta_t)

    # Layout plumbing back to the module's [N, C_OUT] orientation (host-side).
    return out_t.T


if __name__ == "__main__":
    N = 8                 # nodes
    C_IN, C_OUT, C_ATTN = 16, 16, 8
    NUM_BASIS, HIDDEN = 20, 20
    RADIUS = 1.5

    key = jax.random.PRNGKey(0)
    k_pos, k_feat, k_par = jax.random.split(key, 3)
    pos = jax.random.uniform(k_pos, (N, 3), jnp.float32, minval=0.0, maxval=2.0)
    f_in = jax.random.normal(k_feat, (N, C_IN), jnp.float32)
    params = init_params(k_par, c_in=C_IN, c_out=C_OUT, c_attn=C_ATTN,
                         num_basis=NUM_BASIS, hidden=HIDDEN)

    f_out = se3_transformer_forward(pos, f_in, params, radius=RADIUS, num_basis=NUM_BASIS)
    jax.block_until_ready(f_out)
    assert f_out.shape == (N, C_OUT) and bool(jnp.all(jnp.isfinite(f_out)))
    print("KERNEL_OK")
</pallas_src>

<mosaic_0001>
module attributes {stable_mosaic.version = 11 : i64} {
  func.func @se3_transformer_kernel(%arg0: i32, %arg1: memref<1x128xi32, #tpu.memory_space<vmem>>, %arg2: memref<1x128xi32, #tpu.memory_space<vmem>>, %arg3: memref<128x1xi32, #tpu.memory_space<vmem>>, %arg4: memref<3x8xf32, #tpu.memory_space<vmem>>, %arg5: memref<16x8xf32, #tpu.memory_space<vmem>>, %arg6: memref<40x20xf32, #tpu.memory_space<vmem>>, %arg7: memref<24x640xf32, #tpu.memory_space<vmem>>, %arg8: memref<8x16xf32, #tpu.memory_space<vmem>>, %arg9: memref<16x16xf32, #tpu.memory_space<vmem>>, %arg10: memref<16x1xf32, #tpu.memory_space<vmem>>, %arg11: memref<16x1xf32, #tpu.memory_space<vmem>>, %arg12: memref<16x8xf32, #tpu.memory_space<vmem>>, %arg13: memref<1x8xf32, #tpu.memory_space<vmem>>, %arg14: memref<16x8xf32, #tpu.memory_space<vmem>>) attributes {dimension_semantics = [#tpu.dimension_semantics<arbitrary>], iteration_bounds = array<i64: 1>, scalar_prefetch = 0 : i64, scratch_operands = 2 : i64, tpu.core_type = #tpu.core_type<tc>, window_params = [{transform_indices = @transform_0, window_bounds = array<i64: 1, 128>}, {transform_indices = @transform_1, window_bounds = array<i64: 1, 128>}, {transform_indices = @transform_2, window_bounds = array<i64: 128, 1>}, {pipeline_mode = #tpu.pipeline_mode<synchronous>, transform_indices = @transform_3, window_bounds = array<i64: 3, 8>}, {pipeline_mode = #tpu.pipeline_mode<synchronous>, transform_indices = @transform_4, window_bounds = array<i64: 16, 8>}, {pipeline_mode = #tpu.pipeline_mode<synchronous>, transform_indices = @transform_5, window_bounds = array<i64: 40, 20>}, {pipeline_mode = #tpu.pipeline_mode<synchronous>, transform_indices = @transform_6, window_bounds = array<i64: 24, 640>}, {pipeline_mode = #tpu.pipeline_mode<synchronous>, transform_indices = @transform_7, window_bounds = array<i64: 8, 16>}, {pipeline_mode = #tpu.pipeline_mode<synchronous>, transform_indices = @transform_8, window_bounds = array<i64: 16, 16>}, {pipeline_mode = #tpu.pipeline_mode<synchronous>, transform_indices = @transform_9, window_bounds = array<i64: 16, 1>}, {pipeline_mode = #tpu.pipeline_mode<synchronous>, transform_indices = @transform_10, window_bounds = array<i64: 16, 1>}, {pipeline_mode = #tpu.pipeline_mode<synchronous>, transform_indices = @transform_11, window_bounds = array<i64: 16, 8>}]} {
    %c0_i32 = arith.constant 0 : i32
    %0 = arith.cmpi eq, %arg0, %c0_i32 : i32
    %1 = arith.extui %0 : i1 to i32
    %c0_i32_0 = arith.constant 0 : i32
    %2 = arith.cmpi ne, %1, %c0_i32_0 : i32
    scf.if %2 {
      %cst_67 = arith.constant 0.000000e+00 : f32
      %135 = vector.broadcast %cst_67 : f32 to vector<1x8xf32>
      %c0_68 = arith.constant 0 : index
      %c0_69 = arith.constant 0 : index
      %136 = vector.load %arg13[%c0_68, %c0_69] : memref<1x8xf32, #tpu.memory_space<vmem>>, vector<1x8xf32>
      tpu.vector_store %arg13[%c0_68, %c0_69], %135 {strides = array<i32>} : memref<1x8xf32, #tpu.memory_space<vmem>>, vector<1x8xf32>,
      %cst_70 = arith.constant 0.000000e+00 : f32
      %137 = vector.broadcast %cst_70 : f32 to vector<16x8xf32>
      %c0_71 = arith.constant 0 : index
      %c0_72 = arith.constant 0 : index
      %138 = vector.load %arg14[%c0_71, %c0_72] : memref<16x8xf32, #tpu.memory_space<vmem>>, vector<16x8xf32>
      tpu.vector_store %arg14[%c0_71, %c0_72], %137 {strides = array<i32>} : memref<16x8xf32, #tpu.memory_space<vmem>>, vector<16x8xf32>,
    } else {
    }
    %c0 = arith.constant 0 : index
    %c0_1 = arith.constant 0 : index
    %3 = vector.load %arg1[%c0, %c0_1] : memref<1x128xi32, #tpu.memory_space<vmem>>, vector<1x128xi32>
    %c0_2 = arith.constant 0 : index
    %c0_3 = arith.constant 0 : index
    %4 = vector.load %arg2[%c0_2, %c0_3] : memref<1x128xi32, #tpu.memory_space<vmem>>, vector<1x128xi32>
    %c0_4 = arith.constant 0 : index
    %c0_5 = arith.constant 0 : index
    %5 = vector.load %arg3[%c0_4, %c0_5] : memref<128x1xi32, #tpu.memory_space<vmem>>, vector<128x1xi32>
    %6 = tpu.iota {dimensions = array<i32: 0>} : vector<8x128xi32>
    %7 = tpu.iota {dimensions = array<i32: 1>} : vector<128x8xi32>
    %8 = vector.broadcast %3 : vector<1x128xi32> to vector<8x128xi32>
    %9 = arith.cmpi eq, %6, %8 : vector<8x128xi32>
    %cst = arith.constant 1.000000e+00 : f32
    %cst_6 = arith.constant 0.000000e+00 : f32
    %10 = vector.broadcast %cst : f32 to vector<8x128xf32>
    %11 = vector.broadcast %cst_6 : f32 to vector<8x128xf32>
    %12 = arith.select %9, %10, %11 : vector<8x128xi1>, vector<8x128xf32>
    %13 = vector.broadcast %4 : vector<1x128xi32> to vector<8x128xi32>
    %14 = arith.cmpi eq, %6, %13 : vector<8x128xi32>
    %cst_7 = arith.constant 1.000000e+00 : f32
    %cst_8 = arith.constant 0.000000e+00 : f32
    %15 = vector.broadcast %cst_7 : f32 to vector<8x128xf32>
    %16 = vector.broadcast %cst_8 : f32 to vector<8x128xf32>
    %17 = arith.select %14, %15, %16 : vector<8x128xi1>, vector<8x128xf32>
    %18 = arith.truncf %12 : vector<8x128xf32> to vector<8x128xbf16>
    %19 = arith.truncf %17 : vector<8x128xf32> to vector<8x128xbf16>
    %20 = arith.subf %17, %12 : vector<8x128xf32>
    %21 = arith.truncf %20 : vector<8x128xf32> to vector<8x128xbf16>
    %22 = vector.broadcast %5 : vector<128x1xi32> to vector<128x8xi32>
    %23 = arith.cmpi eq, %7, %22 : vector<128x8xi32>
    %cst_9 = arith.constant 1.000000e+00 : f32
    %cst_10 = arith.constant 0.000000e+00 : f32
    %24 = vector.broadcast %cst_9 : f32 to vector<128x8xf32>
    %25 = vector.broadcast %cst_10 : f32 to vector<128x8xf32>
    %26 = arith.select %23, %24, %25 : vector<128x8xi1>, vector<128x8xf32>
    %c0_11 = arith.constant 0 : index
    %c0_12 = arith.constant 0 : index
    %27 = vector.load %arg4[%c0_11, %c0_12] : memref<3x8xf32, #tpu.memory_space<vmem>>, vector<3x8xf32>
    %28 = arith.truncf %27 : vector<3x8xf32> to vector<3x8xbf16>
    %c0_13 = arith.constant 0 : index
    %c0_14 = arith.constant 0 : index
    %29 = vector.load %arg5[%c0_13, %c0_14] : memref<16x8xf32, #tpu.memory_space<vmem>>, vector<16x8xf32>
    %30 = arith.truncf %29 : vector<16x8xf32> to vector<16x8xbf16>
    %cst_15 = arith.constant dense<0.000000e+00> : vector<3x128xf32>
    %31 = tpu.matmul %28, %21, %cst_15 {dimension_numbers = #tpu.dot_dimension_numbers<[1], [0], [0], [1], [0, 0, 1, 1], [], []>} : vector<3x8xbf16>, vector<8x128xbf16>, vector<3x128xf32> -> vector<3x128xf32>
    %32 = arith.mulf %31, %31 : vector<3x128xf32>
    %cst_16 = arith.constant dense<0.000000e+00> : vector<128xf32>
    %33 = vector.multi_reduction <add>, %32, %cst_16 [0] : vector<3x128xf32> to vector<128xf32>
    %34 = vector.shape_cast %33 : vector<128xf32> to vector<1x128xf32>
    %35 = math.sqrt %34 : vector<1x128xf32>
    %cst_17 = arith.constant 1.500000e+00 : f32
    %36 = vector.broadcast %cst_17 : f32 to vector<1x128xf32>
    %37 = arith.cmpf ole, %35, %36 : vector<1x128xf32>
    %38 = arith.extui %37 : vector<1x128xi1> to vector<1x128xi32>
    %39 = arith.sitofp %38 : vector<1x128xi32> to vector<1x128xf32>
    %40 = tpu.iota {dimensions = array<i32: 0>} : vector<20x1xi32>
    %41 = arith.sitofp %40 : vector<20x1xi32> to vector<20x1xf32>
    %cst_18 = arith.constant 1.000000e+00 : f32
    %42 = vector.broadcast %cst_18 : f32 to vector<20x1xf32>
    %43 = arith.addf %41, %42 : vector<20x1xf32>
    %cst_19 = arith.constant 0.0714285746 : f32
    %44 = vector.broadcast %cst_19 : f32 to vector<20x1xf32>
    %45 = arith.mulf %43, %44 : vector<20x1xf32>
    %46 = vector.broadcast %35 : vector<1x128xf32> to vector<20x128xf32>
    %47 = vector.broadcast %45 : vector<20x1xf32> to vector<20x128xf32>
    %48 = arith.subf %46, %47 : vector<20x128xf32>
    %cst_20 = arith.constant 1.400000e+01 : f32
    %49 = vector.broadcast %cst_20 : f32 to vector<20x128xf32>
    %50 = arith.mulf %48, %49 : vector<20x128xf32>
    %cst_21 = arith.constant 1.000000e+00 : f32
    %51 = vector.broadcast %cst_21 : f32 to vector<20x128xf32>
    %52 = arith.addf %50, %51 : vector<20x128xf32>
    %cst_22 = arith.constant 0.000000e+00 : f32
    %53 = vector.broadcast %cst_22 : f32 to vector<20x128xf32>
    %54 = arith.cmpf ogt, %52, %53 : vector<20x128xf32>
    %cst_23 = arith.constant 1.000000e+00 : f32
    %55 = vector.broadcast %cst_23 : f32 to vector<20x128xf32>
    %56 = arith.select %54, %52, %55 : vector<20x128xi1>, vector<20x128xf32>
    %cst_24 = arith.constant 0.000000e+00 : f32
    %57 = vector.broadcast %cst_24 : f32 to vector<20x128xf32>
    %58 = arith.cmpf ogt, %52, %57 : vector<20x128xf32>
    %cst_25 = arith.constant -1.000000e+00 : f32
    %59 = vector.broadcast %cst_25 : f32 to vector<20x128xf32>
    %60 = arith.divf %59, %56 : vector<20x128xf32>
    %61 = math.exp %60 : vector<20x128xf32>
    %cst_26 = arith.constant 0.000000e+00 : f32
    %62 = vector.broadcast %cst_26 : f32 to vector<20x128xf32>
    %63 = arith.select %58, %61, %62 : vector<20x128xi1>, vector<20x128xf32>
    %cst_27 = arith.constant 1.000000e+00 : f32
    %64 = vector.broadcast %cst_27 : f32 to vector<20x128xf32>
    %65 = arith.subf %64, %50 : vector<20x128xf32>
    %cst_28 = arith.constant 0.000000e+00 : f32
    %66 = vector.broadcast %cst_28 : f32 to vector<20x128xf32>
    %67 = arith.cmpf ogt, %65, %66 : vector<20x128xf32>
    %cst_29 = arith.constant 1.000000e+00 : f32
    %68 = vector.broadcast %cst_29 : f32 to vector<20x128xf32>
    %69 = arith.select %67, %65, %68 : vector<20x128xi1>, vector<20x128xf32>
    %cst_30 = arith.constant 0.000000e+00 : f32
    %70 = vector.broadcast %cst_30 : f32 to vector<20x128xf32>
    %71 = arith.cmpf ogt, %65, %70 : vector<20x128xf32>
    %cst_31 = arith.constant -1.000000e+00 : f32
    %72 = vector.broadcast %cst_31 : f32 to vector<20x128xf32>
    %73 = arith.divf %72, %69 : vector<20x128xf32>
    %74 = math.exp %73 : vector<20x128xf32>
    %cst_32 = arith.constant 0.000000e+00 : f32
    %75 = vector.broadcast %cst_32 : f32 to vector<20x128xf32>
    %76 = arith.select %71, %74, %75 : vector<20x128xi1>, vector<20x128xf32>
    %77 = arith.mulf %63, %76 : vector<20x128xf32>
    %cst_33 = arith.constant 0.666666686 : f32
    %78 = vector.broadcast %cst_33 : f32 to vector<1x128xf32>
    %79 = arith.mulf %35, %78 : vector<1x128xf32>
    %cst_34 = arith.constant 1.000000e+00 : f32
    %80 = vector.broadcast %cst_34 : f32 to vector<1x128xf32>
    %81 = arith.subf %80, %79 : vector<1x128xf32>
    %cst_35 = arith.constant 1.000000e+01 : f32
    %82 = vector.broadcast %cst_35 : f32 to vector<1x128xf32>
    %83 = arith.mulf %82, %81 : vector<1x128xf32>
    %cst_36 = arith.constant 0.000000e+00 : f32
    %84 = vector.broadcast %cst_36 : f32 to vector<1x128xf32>
    %85 = arith.cmpf ogt, %83, %84 : vector<1x128xf32>
    %cst_37 = arith.constant 1.000000e+00 : f32
    %86 = vector.broadcast %cst_37 : f32 to vector<1x128xf32>
    %87 = arith.select %85, %83, %86 : vector<1x128xi1>, vector<1x128xf32>
    %cst_38 = arith.constant 0.000000e+00 : f32
    %88 = vector.broadcast %cst_38 : f32 to vector<1x128xf32>
    %89 = arith.cmpf ogt, %83, %88 : vector<1x128xf32>
    %cst_39 = arith.constant -1.000000e+00 : f32
    %90 = vector.broadcast %cst_39 : f32 to vector<1x128xf32>
    %91 = arith.divf %90, %87 : vector<1x128xf32>
    %92 = math.exp %91 : vector<1x128xf32>
    %cst_40 = arith.constant 0.000000e+00 : f32
    %93 = vector.broadcast %cst_40 : f32 to vector<1x128xf32>
    %94 = arith.select %89, %92, %93 : vector<1x128xi1>, vector<1x128xf32>
    %c0_41 = arith.constant 0 : index
    %c0_42 = arith.constant 0 : index
    %95 = vector.load %arg6[%c0_41, %c0_42] : memref<40x20xf32, #tpu.memory_space<vmem>>, vector<40x20xf32>
    %cst_43 = arith.constant dense<0.000000e+00> : vector<40x128xf32>
    %96 = tpu.matmul %95, %77, %cst_43 {dimension_numbers = #tpu.dot_dimension_numbers<[1], [0], [0], [1], [0, 0, 1, 1], [], []>} : vector<40x20xf32>, vector<20x128xf32>, vector<40x128xf32> -> vector<40x128xf32>
    %cst_44 = arith.constant 0.000000e+00 : f32
    %97 = vector.broadcast %cst_44 : f32 to vector<40x128xf32>
    %98 = arith.maximumf %96, %97 : vector<40x128xf32>
    %cst_45 = arith.constant dense<0.000000e+00> : vector<16x128xf32>
    %99 = tpu.matmul %30, %18, %cst_45 {dimension_numbers = #tpu.dot_dimension_numbers<[1], [0], [0], [1], [0, 0, 1, 1], [], []>} : vector<16x8xbf16>, vector<8x128xbf16>, vector<16x128xf32> -> vector<16x128xf32>
    %100 = vector.shape_cast %98 : vector<40x128xf32> to vector<40x1x128xf32>
    %101 = vector.shape_cast %99 : vector<16x128xf32> to vector<1x16x128xf32>
    %102 = vector.broadcast %100 : vector<40x1x128xf32> to vector<40x16x128xf32>
    %103 = vector.broadcast %101 : vector<1x16x128xf32> to vector<40x16x128xf32>
    %104 = arith.mulf %102, %103 : vector<40x16x128xf32>
    %105 = vector.shape_cast %104 : vector<40x16x128xf32> to vector<640x128xf32>
    %c0_46 = arith.constant 0 : index
    %c0_47 = arith.constant 0 : index
    %106 = vector.load %arg7[%c0_46, %c0_47] : memref<24x640xf32, #tpu.memory_space<vmem>>, vector<24x640xf32>
    %cst_48 = arith.constant dense<0.000000e+00> : vector<24x128xf32>
    %107 = tpu.matmul %106, %105, %cst_48 {dimension_numbers = #tpu.dot_dimension_numbers<[1], [0], [0], [1], [0, 0, 1, 1], [], []>} : vector<24x640xf32>, vector<640x128xf32>, vector<24x128xf32> -> vector<24x128xf32>
    %108 = vector.extract_strided_slice %107 {offsets = [0, 0], sizes = [8, 128], strides = [1, 1]} : vector<24x128xf32> to vector<8x128xf32>
    %109 = vector.extract_strided_slice %107 {offsets = [8, 0], sizes = [16, 128], strides = [1, 1]} : vector<24x128xf32> to vector<16x128xf32>
    %cst_49 = arith.constant dense<0.000000e+00> : vector<16x128xf32>
    %110 = tpu.matmul %30, %19, %cst_49 {dimension_numbers = #tpu.dot_dimension_numbers<[1], [0], [0], [1], [0, 0, 1, 1], [], []>} : vector<16x8xbf16>, vector<8x128xbf16>, vector<16x128xf32> -> vector<16x128xf32>
    %c0_50 = arith.constant 0 : index
    %c0_51 = arith.constant 0 : index
    %111 = vector.load %arg8[%c0_50, %c0_51] : memref<8x16xf32, #tpu.memory_space<vmem>>, vector<8x16xf32>
    %cst_52 = arith.constant dense<0.000000e+00> : vector<8x128xf32>
    %112 = tpu.matmul %111, %110, %cst_52 {dimension_numbers = #tpu.dot_dimension_numbers<[1], [0], [0], [1], [0, 0, 1, 1], [], []>} : vector<8x16xf32>, vector<16x128xf32>, vector<8x128xf32> -> vector<8x128xf32>
    %113 = arith.mulf %112, %108 : vector<8x128xf32>
    %cst_53 = arith.constant dense<0.000000e+00> : vector<128xf32>
    %114 = vector.multi_reduction <add>, %113, %cst_53 [0] : vector<8x128xf32> to vector<128xf32>
    %115 = vector.shape_cast %114 : vector<128xf32> to vector<1x128xf32>
    %116 = arith.mulf %39, %94 : vector<1x128xf32>
    %cst_54 = arith.constant 6.000000e+01 : f32
    %117 = vector.broadcast %cst_54 : f32 to vector<1x128xf32>
    %118 = arith.minimumf %115, %117 : vector<1x128xf32>
    %119 = math.exp %118 : vector<1x128xf32>
    %120 = arith.mulf %116, %119 : vector<1x128xf32>
    %121 = math.sqrt %120 : vector<1x128xf32>
    %c0_55 = arith.constant 0 : index
    %c0_56 = arith.constant 0 : index
    %122 = vector.load %arg13[%c0_55, %c0_56] : memref<1x8xf32, #tpu.memory_space<vmem>>, vector<1x8xf32>
    %cst_57 = arith.constant dense<0.000000e+00> : vector<1x8xf32>
    %123 = tpu.matmul %120, %26, %cst_57 {dimension_numbers = #tpu.dot_dimension_numbers<[1], [0], [0], [1], [0, 0, 1, 1], [], []>} : vector<1x128xf32>, vector<128x8xf32>, vector<1x8xf32> -> vector<1x8xf32>
    %124 = arith.addf %122, %123 : vector<1x8xf32>
    %c0_58 = arith.constant 0 : index
    %c0_59 = arith.constant 0 : index
    %125 = vector.load %arg13[%c0_58, %c0_59] : memref<1x8xf32, #tpu.memory_space<vmem>>, vector<1x8xf32>
    tpu.vector_store %arg13[%c0_58, %c0_59], %124 {strides = array<i32>} : memref<1x8xf32, #tpu.memory_space<vmem>>, vector<1x8xf32>,
    %c0_60 = arith.constant 0 : index
    %c0_61 = arith.constant 0 : index
    %126 = vector.load %arg14[%c0_60, %c0_61] : memref<16x8xf32, #tpu.memory_space<vmem>>, vector<16x8xf32>
    %127 = vector.broadcast %121 : vector<1x128xf32> to vector<16x128xf32>
    %128 = arith.mulf %127, %109 : vector<16x128xf32>
    %cst_62 = arith.constant dense<0.000000e+00> : vector<16x8xf32>
    %129 = tpu.matmul %128, %26, %cst_62 {dimension_numbers = #tpu.dot_dimension_numbers<[1], [0], [0], [1], [0, 0, 1, 1], [], []>} : vector<16x128xf32>, vector<128x8xf32>, vector<16x8xf32> -> vector<16x8xf32>
    %130 = arith.addf %126, %129 : vector<16x8xf32>
    %c0_63 = arith.constant 0 : index
    %c0_64 = arith.constant 0 : index
    %131 = vector.load %arg14[%c0_63, %c0_64] : memref<16x8xf32, #tpu.memory_space<vmem>>, vector<16x8xf32>
    tpu.vector_store %arg14[%c0_63, %c0_64], %130 {strides = array<i32>} : memref<16x8xf32, #tpu.memory_space<vmem>>, vector<16x8xf32>,
    %c0_i32_65 = arith.constant 0 : i32
    %132 = arith.cmpi eq, %arg0, %c0_i32_65 : i32
    %133 = arith.extui %132 : i1 to i32
    %c0_i32_66 = arith.constant 0 : i32
    %134 = arith.cmpi ne, %133, %c0_i32_66 : i32
    scf.if %134 {
      %c0_67 = arith.constant 0 : index
      %c0_68 = arith.constant 0 : index
      %135 = vector.load %arg13[%c0_67, %c0_68] : memref<1x8xf32, #tpu.memory_space<vmem>>, vector<1x8xf32>
      %cst_69 = arith.constant 0.000000e+00 : f32
      %136 = vector.broadcast %cst_69 : f32 to vector<1x8xf32>
      %137 = arith.cmpf ole, %135, %136 : vector<1x8xf32>
      %cst_70 = arith.constant 1.000000e+00 : f32
      %138 = vector.broadcast %cst_70 : f32 to vector<1x8xf32>
      %139 = arith.select %137, %138, %135 : vector<1x8xi1>, vector<1x8xf32>
      %140 = math.rsqrt %139 : vector<1x8xf32>
      %c0_71 = arith.constant 0 : index
      %c0_72 = arith.constant 0 : index
      %141 = vector.load %arg14[%c0_71, %c0_72] : memref<16x8xf32, #tpu.memory_space<vmem>>, vector<16x8xf32>
      %142 = vector.broadcast %140 : vector<1x8xf32> to vector<16x8xf32>
      %143 = arith.mulf %141, %142 : vector<16x8xf32>
      %c0_73 = arith.constant 0 : index
      %c0_74 = arith.constant 0 : index
      %144 = vector.load %arg9[%c0_73, %c0_74] : memref<16x16xf32, #tpu.memory_space<vmem>>, vector<16x16xf32>
      %cst_75 = arith.constant dense<0.000000e+00> : vector<16x8xf32>
      %145 = tpu.matmul %144, %29, %cst_75 {dimension_numbers = #tpu.dot_dimension_numbers<[1], [0], [0], [1], [0, 0, 1, 1], [], []>} : vector<16x16xf32>, vector<16x8xf32>, vector<16x8xf32> -> vector<16x8xf32>
      %146 = arith.addf %143, %145 : vector<16x8xf32>
      %cst_76 = arith.constant dense<0.000000e+00> : vector<16xf32>
      %147 = vector.multi_reduction <add>, %146, %cst_76 [1] : vector<16x8xf32> to vector<16xf32>
      %148 = vector.shape_cast %147 : vector<16xf32> to vector<16x1xf32>
      %cst_77 = arith.constant 8.000000e+00 : f32
      %149 = vector.broadcast %cst_77 : f32 to vector<16x1xf32>
      %150 = arith.divf %148, %149 : vector<16x1xf32>
      %151 = vector.broadcast %150 : vector<16x1xf32> to vector<16x8xf32>
      %152 = arith.subf %146, %151 : vector<16x8xf32>
      %153 = arith.mulf %152, %152 : vector<16x8xf32>
      %cst_78 = arith.constant dense<0.000000e+00> : vector<16xf32>
      %154 = vector.multi_reduction <add>, %153, %cst_78 [1] : vector<16x8xf32> to vector<16xf32>
      %155 = vector.shape_cast %154 : vector<16xf32> to vector<16x1xf32>
      %cst_79 = arith.constant 8.000000e+00 : f32
      %156 = vector.broadcast %cst_79 : f32 to vector<16x1xf32>
      %157 = arith.divf %155, %156 : vector<16x1xf32>
      %cst_80 = arith.constant 9.99999974E-6 : f32
      %158 = vector.broadcast %cst_80 : f32 to vector<16x1xf32>
      %159 = arith.addf %157, %158 : vector<16x1xf32>
      %160 = math.rsqrt %159 : vector<16x1xf32>
      %161 = vector.broadcast %160 : vector<16x1xf32> to vector<16x8xf32>
      %162 = arith.mulf %152, %161 : vector<16x8xf32>
      %c0_81 = arith.constant 0 : index
      %c0_82 = arith.constant 0 : index
      %163 = vector.load %arg10[%c0_81, %c0_82] : memref<16x1xf32, #tpu.memory_space<vmem>>, vector<16x1xf32>
      %164 = vector.broadcast %163 : vector<16x1xf32> to vector<16x8xf32>
      %165 = arith.mulf %162, %164 : vector<16x8xf32>
      %c0_83 = arith.constant 0 : index
      %c0_84 = arith.constant 0 : index
      %166 = vector.load %arg11[%c0_83, %c0_84] : memref<16x1xf32, #tpu.memory_space<vmem>>, vector<16x1xf32>
      %167 = vector.broadcast %166 : vector<16x1xf32> to vector<16x8xf32>
      %168 = arith.addf %165, %167 : vector<16x8xf32>
      %c0_85 = arith.constant 0 : index
      %c0_86 = arith.constant 0 : index
      %169 = vector.load %arg12[%c0_85, %c0_86] : memref<16x8xf32, #tpu.memory_space<vmem>>, vector<16x8xf32>
      tpu.vector_store %arg12[%c0_85, %c0_86], %168 {strides = array<i32>} : memref<16x8xf32, #tpu.memory_space<vmem>>, vector<16x8xf32>,
    } else {
    }
    return
  }
  func.func @transform_0(%arg0: i32) -> (i32, i32) {
    %c0_i32 = arith.constant 0 : i32
    %c0_i32_0 = arith.constant 0 : i32
    return %c0_i32, %arg0 : i32, i32
  }
  func.func @transform_1(%arg0: i32) -> (i32, i32) {
    %c0_i32 = arith.constant 0 : i32
    %c0_i32_0 = arith.constant 0 : i32
    return %c0_i32, %arg0 : i32, i32
  }
  func.func @transform_2(%arg0: i32) -> (i32, i32) {
    %c0_i32 = arith.constant 0 : i32
    %c0_i32_0 = arith.constant 0 : i32
    return %arg0, %c0_i32 : i32, i32
  }
  func.func @transform_3(%arg0: i32) -> (i32, i32) {
    %c0_i32 = arith.constant 0 : i32
    %c0_i32_0 = arith.constant 0 : i32
    %c0_i32_1 = arith.constant 0 : i32
    return %c0_i32, %c0_i32_0 : i32, i32
  }
  func.func @transform_4(%arg0: i32) -> (i32, i32) {
    %c0_i32 = arith.constant 0 : i32
    %c0_i32_0 = arith.constant 0 : i32
    %c0_i32_1 = arith.constant 0 : i32
    return %c0_i32, %c0_i32_0 : i32, i32
  }
  func.func @transform_5(%arg0: i32) -> (i32, i32) {
    %c0_i32 = arith.constant 0 : i32
    %c0_i32_0 = arith.constant 0 : i32
    %c0_i32_1 = arith.constant 0 : i32
    return %c0_i32, %c0_i32_0 : i32, i32
  }
  func.func @transform_6(%arg0: i32) -> (i32, i32) {
    %c0_i32 = arith.constant 0 : i32
    %c0_i32_0 = arith.constant 0 : i32
    %c0_i32_1 = arith.constant 0 : i32
    return %c0_i32, %c0_i32_0 : i32, i32
  }
  func.func @transform_7(%arg0: i32) -> (i32, i32) {
    %c0_i32 = arith.constant 0 : i32
    %c0_i32_0 = arith.constant 0 : i32
    %c0_i32_1 = arith.constant 0 : i32
    return %c0_i32, %c0_i32_0 : i32, i32
  }
  func.func @transform_8(%arg0: i32) -> (i32, i32) {
    %c0_i32 = arith.constant 0 : i32
    %c0_i32_0 = arith.constant 0 : i32
    %c0_i32_1 = arith.constant 0 : i32
    return %c0_i32, %c0_i32_0 : i32, i32
  }
  func.func @transform_9(%arg0: i32) -> (i32, i32) {
    %c0_i32 = arith.constant 0 : i32
    %c0_i32_0 = arith.constant 0 : i32
    %c0_i32_1 = arith.constant 0 : i32
    return %c0_i32, %c0_i32_0 : i32, i32
  }
  func.func @transform_10(%arg0: i32) -> (i32, i32) {
    %c0_i32 = arith.constant 0 : i32
    %c0_i32_0 = arith.constant 0 : i32
    %c0_i32_1 = arith.constant 0 : i32
    return %c0_i32, %c0_i32_0 : i32, i32
  }
  func.func @transform_11(%arg0: i32) -> (i32, i32) {
    %c0_i32 = arith.constant 0 : i32
    %c0_i32_0 = arith.constant 0 : i32
    %c0_i32_1 = arith.constant 0 : i32
    return %c0_i32, %c0_i32_0 : i32, i32
  }
}

</mosaic_0001>

<bundles_post_ra>
// kernel: tpu_custom_call.1
= control target key start
LH: loop header
LB: loop body
LE: loop exit
PB: predicated region body
PF: predicated region fallthrough
CT: control target
= control target key end

     0   :  { %v66_v0 = vlaneseq  ;;  %v2142_v1 = vmov 0.0   ;;  %vm45_vm0 = vcmask 64512   ;;  %vm2143_vm1 = vmmov 0   ;;  %s2856_s0 = inlined_call_operand.vmem [shape: s32[1,128], index: 0, kind: input, shape index: {}]   ;;  %s2857_s1 = inlined_call_operand.vmem [shape: s32[1,128], index: 1, kind: input, shape index: {}]   ;;  %s2858_s3 = inlined_call_operand.vmem [shape: f32[3,8], index: 3, kind: input, shape index: {}]   ;;  %s2859_s4 = inlined_call_operand.vmem [shape: f32[16,8], index: 4, kind: input, shape index: {}]   ;;  %s2860_s5 = inlined_call_operand.vmem [shape: f32[40,20], index: 5, kind: input, shape index: {}]   ;;  %s2861_s6 = inlined_call_operand.vmem [shape: f32[24,640], index: 6, kind: input, shape index: {}]   ;;  %s2862_s2 = inlined_call_operand.vmem [shape: s32[128,1], index: 2, kind: input, shape index: {}]   ;;  %s2863_s7 = inlined_call_operand.vmem [shape: f32[8,16], index: 7, kind: input, shape index: {}]   ;;  %s2864_s8 = inlined_call_operand.vmem [shape: f32[16,16], index: 8, kind: input, shape index: {}]   ;;  %s2865_s9 = inlined_call_operand.vmem [shape: f32[16,1], index: 9, kind: input, shape index: {}]   ;;  %s2866_s10 = inlined_call_operand.vmem [shape: f32[16,1], index: 10, kind: input, shape index: {}]   ;;  %s2867_s11 = inlined_call_operand.vmem [shape: f32[16,8], index: 11, kind: output, shape index: {}]  }
   0x1   :  { %1929 = vmatprep.subr.bf16.mxu0 %v2142_v1  ;;  %v1725_v2 = vld [vmem:[%s2856_s0] ss:$0 sm:$0xff]  ;;  %1935 = vmatprep.subr.mxu1 %v2142_v1  ;;  %46 = vst.msk [vmem:[#allocation3] sm:$0xff] %vm45_vm0, %v2142_v1  ;;  %47 = vst.msk [vmem:[#allocation3 + $0x8] sm:$0xff] %vm45_vm0, %v2142_v1  ;;  %vm175_vm4 = vcmask 1043456   ;;  %v169_v15 = vld [vmem:[%s2859_s4 + $0x8] sm:$0xff] }
   0x2   :  { %v1726_v3 = vld [vmem:[%s2857_s1] ss:$0 sm:$0xff]  ;;  %v2216_v4 = vshrl.u32 %v66_v0, 7  ;;  %1931 = vmatprep.mubr.msk.bf16.mxu0 %vm2143_vm1, %v2142_v1  ;;  %1941 = vmatprep.mubr.msk.f32.mxu1 %vm2143_vm1, %v2142_v1  ;;  %vm220_vm5 = vcmask 1042432   ;;  %vm321_vm14 = vcmask 162816   ;;  %vm1312_vm15 = vcmask 130048  }
   0x3   :  { %v166_v8 = vld [vmem:[%s2858_s3] sm:$0x7] }
   0x4   :  { %vm74_vm2 = vcmp.eq.s32.totalorder %v2216_v4, %v1725_v2  ;;  %vm80_vm3 = vcmp.eq.s32.totalorder %v2216_v4, %v1726_v3  ;;  %v167_v11 = vpack.c.bf16 %v166_v8, %v166_v8  ;;  %v168_v14 = vld [vmem:[%s2859_s4] sm:$0xff]  ;;  %v239_v29 = vadd.s32 16, %v2216_v4 }
   0x5   :  { %v75_v5 = vsel %vm74_vm2, 1.0, %v2142_v1  ;;  %v2230_v6 = vsel %vm80_vm3, 1.0, %v2142_v1  ;;  %v2248_v16 = vpack.c.bf16 %v169_v15, %v168_v14  ;;  %v238_v30 = vadd.s32 8, %v2216_v4 }
   0x6   :  { %v84_v7 = vsub.f32 %v2230_v6, %v75_v5  ;;  %v82_v12 = vpack.c.bf16 %v75_v5, %v75_v5  ;;  %v242_v31 = vcvt.s32.f32 %v239_v29  ;;  %v240_v33 = vcvt.s32.f32 %v2216_v4 }
   0x7   :  { %v241_v32 = vcvt.s32.f32 %v238_v30 }
   0x8   :  { %v85_v9 = vpack.c.bf16 %v84_v7, %v84_v7  ;;  %v439_v13 = vsel %vm175_vm4, %v82_v12, 0  ;;  %v245_v34 = vadd.f32 1.0, %v242_v31  ;;  %v243_v36 = vadd.f32 1.0, %v240_v33 }
   0x9   :  { %v244_v35 = vadd.f32 1.0, %v241_v32 }
   0xa   :  { %v177_v10 = vsel %vm175_vm4, %v85_v9, 0  ;;  %v248_v39 = vmul.f32 0.071428575, %v245_v34  ;;  %v246_v42 = vmul.f32 0.071428575, %v243_v36 }
   0xb   :  { %1930 = vmatpush3.bf16.msra.mxu0 %v177_v10  ;;  %v247_v40 = vmul.f32 0.071428575, %v244_v35 }
   0xc   :  { %1956 = vmatprep.subr.bf16.mxu0 %v2142_v1 }
   0xe   :  { %1932 = vmatmul.mubr.msk.bf16.vlgmr.msra.gmra.mxu0 %vm45_vm0, %v167_v11 }
   0xf   :  { %1958 = vmatprep.mubr.msk.bf16.mxu0 %vm2143_vm1, %v2142_v1  ;;  %1957 = vmatpush3.bf16.msra.mxu0 %v439_v13 }
  0x16   :  { %1959 = vmatmul.mubr.msk.bf16.vlgmr.msra.gmra.mxu0 %vm45_vm0, %v2248_v16 }
  0xce   :  { %v213_v17 = vpop.f32.mrf.mxu0 }
  0xcf   :  { %v219_v18 = vmul.f32 %v213_v17, %v213_v17 }
  0xd0   :  { %v1933_v19 = vpop.f32.mrf.mxu0 }
  0xd1   :  { %v221_v20 = vsel %vm220_vm5, %v219_v18, 0.0 }
  0xd2   :  { %v222_v21 = vrot.slane %v221_v20, 4  ;;  %v216_v22 = vpop.f32.mrf.mxu0 }
  0xd4   :  { %v223_v23 = vadd.f32 %v222_v21, %v221_v20  ;;  %v1934_v24 = vpop.f32.mrf.mxu0 }
  0xd6   :  { %v224_v25 = vrot.slane %v223_v23, 2 }
  0xd8   :  { %v225_v26 = vadd.f32 %v224_v25, %v223_v23 }
  0xda   :  { %v226_v27 = vrot.slane %v225_v26, 1 }
  0xdc   :  { %v227_v28 = vadd.f32 %v226_v27, %v225_v26 }
  0xde   :  { %2100 = vrsqrt.f32 %v227_v28  ;;  %vm230_vm6 = vcmp.eq.f32.partialorder %v227_v28, inf  ;;  %v233_v41 = vand.u32 2147483648, %v227_v28  ;;  %vm232_vm7 = vcmp.eq.f32.partialorder %v227_v28, 0.0 }
  0xeb   :  { %v2101_v37 = vpop.eup %2100 }
  0xec   :  { %v229_v38 = vmul.f32 %v2101_v37, %v227_v28 }
  0xee   :  { %v231_v43 = vsel %vm230_vm6, %v227_v28, %v229_v38 }
  0xef   :  { %v2255_v44 = vsel %vm232_vm7, %v233_v41, %v231_v43  ;;  %v317_v41 = vld [vmem:[%s2860_s5 + $0x8] sm:$0xff]  ;;  %v319_v43 = vld [vmem:[%s2860_s5 + $0x18] sm:$0xff] }
  0xf0   :  { %v251_v45 = vsub.f32 %v2255_v44, %v248_v39  ;;  %v250_v46 = vsub.f32 %v2255_v44, %v247_v40  ;;  %v249_v47 = vsub.f32 %v2255_v44, %v246_v42  ;;  %v316_v40 = vld [vmem:[%s2860_s5] sm:$0xff]  ;;  %v318_v42 = vld [vmem:[%s2860_s5 + $0x10] sm:$0xff] }
  0xf2   :  { %v254_v48 = vmul.f32 14.0, %v251_v45  ;;  %v253_v49 = vmul.f32 14.0, %v250_v46  ;;  %v252_v50 = vmul.f32 14.0, %v249_v47  ;;  %v320_v45 = vld [vmem:[%s2860_s5 + $0x20] sm:$0xff]  ;;  %v2316_v46 = vpop.f32.mrf.mxu0 }
  0xf4   :  { %v257_v51 = vadd.f32 1.0, %v254_v48  ;;  %v281_v52 = vsub.f32 1.0, %v254_v48  ;;  %v256_v53 = vadd.f32 1.0, %v253_v49  ;;  %v280_v54 = vsub.f32 1.0, %v253_v49  ;;  %v1960_v47 = vpop.f32.mrf.mxu0 }
  0xf5   :  { %v255_v55 = vadd.f32 1.0, %v252_v50  ;;  %v279_v56 = vsub.f32 1.0, %v252_v50  ;;  %v1013_v50 = vld [vmem:[%s2861_s6 + $0x8] sm:$0xff] }
  0xf6   :  { %vm260_vm8 = vcmp.gt.f32.partialorder %v257_v51, 0.0  ;;  %vm2260_vm9 = vcmp.gt.f32.partialorder %v281_v52, 0.0  ;;  %vm259_vm10 = vcmp.gt.f32.partialorder %v256_v53, 0.0  ;;  %vm2268_vm11 = vcmp.gt.f32.partialorder %v280_v54, 0.0  ;;  %v2318_v48 = vpop.f32.mrf.mxu0 }
  0xf7   :  { %v263_v58 = vsel %vm260_vm8, %v257_v51, 1.0  ;;  %v287_v59 = vsel %vm2260_vm9, %v281_v52, 1.0  ;;  %v262_v60 = vsel %vm259_vm10, %v256_v53, 1.0  ;;  %vm258_vm12 = vcmp.gt.f32.partialorder %v255_v55, 0.0  ;;  %v1015_v51 = vld [vmem:[%s2861_s6 + $0x18] sm:$0xff] }
  0xf8   :  { %2102 = vrcp.f32 %v263_v58  ;;  %vm2272_vm13 = vcmp.gt.f32.partialorder %v279_v56, 0.0  ;;  %v286_v63 = vsel %vm2268_vm11, %v280_v54, 1.0  ;;  %v261_v2 = vsel %vm258_vm12, %v255_v55, 1.0  ;;  %v1961_v49 = vpop.f32.mrf.mxu0  ;;  %1171 = vmatprep.mubr.f32.mxu0 %v1015_v51 }
  0xf9   :  { %2104 = vrcp.f32 %v287_v59  ;;  %v285_v3 = vsel %vm2272_vm13, %v279_v56, 1.0  ;;  %v2144_v52 = vmov 1966171168  }
  0xfa   :  { %2106 = vrcp.f32 %v262_v60  ;;  %v489_v53 = vunpack.c.l.s4 %v2144_v52 }
  0xfb   :  { %2108 = vrcp.f32 %v286_v63 }
  0xfc   :  { %2110 = vrcp.f32 %v261_v2  ;;  %v490_v54 = vunpack.c.0.s8 %v489_v53 }
  0xfd   :  { %2112 = vrcp.f32 %v285_v3 }
  0xfe   :  { %v2327_v58 = vsub.s32 %v490_v54, %v2216_v4 }
 0x105   :  { %v2103_v5 = vpop.eup %2102 }
 0x106   :  { %v2105_v7 = vpop.eup %2104  ;;  %v269_v8 = vmul.f32 -1.0, %v2103_v5 }
 0x107   :  { %v293_v9 = vmul.f32 -1.0, %v2105_v7  ;;  %v2107_v10 = vpop.eup %2106 }
 0x108   :  { %v274_v11 = vmul.f32 1.442695, %v269_v8  ;;  %v2109_v12 = vpop.eup %2108  ;;  %v267_v14 = vmul.f32 -1.0, %v2107_v10 }
 0x109   :  { %v298_v13 = vmul.f32 1.442695, %v293_v9  ;;  %v2111_v15 = vpop.eup %2110  ;;  %v291_v17 = vmul.f32 -1.0, %v2109_v12 }
 0x10a   :  { %2114 = vpow2.f32 %v274_v11  ;;  %v2113_v18 = vpop.eup %2112  ;;  %v272_v19 = vmul.f32 1.442695, %v267_v14  ;;  %v265_v20 = vmul.f32 -1.0, %v2111_v15 }
 0x10b   :  { %2116 = vpow2.f32 %v298_v13  ;;  %v296_v21 = vmul.f32 1.442695, %v291_v17  ;;  %v289_v22 = vmul.f32 -1.0, %v2113_v18  ;;  %v2334_v18 = vsub.s32 0, %v2216_v4 }
 0x10c   :  { %2118 = vpow2.f32 %v272_v19  ;;  %v270_v23 = vmul.f32 1.442695, %v265_v20 }
 0x10d   :  { %2120 = vpow2.f32 %v296_v21  ;;  %v294_v24 = vmul.f32 1.442695, %v289_v22 }
 0x10e   :  { %2122 = vpow2.f32 %v270_v23 }
 0x10f   :  { %2124 = vpow2.f32 %v294_v24 }
 0x117   :  { %v2115_v25 = vpop.eup %2114 }
 0x118   :  { %v2117_v26 = vpop.eup %2116  ;;  %v278_v27 = vsel %vm260_vm8, %v2115_v25, 0.0 }
 0x119   :  { %v302_v28 = vsel %vm2260_vm9, %v2117_v26, 0.0  ;;  %v2119_v29 = vpop.eup %2118 }
 0x11a   :  { %v305_v30 = vmul.f32 %v302_v28, %v278_v27  ;;  %v2121_v31 = vpop.eup %2120  ;;  %v277_v32 = vsel %vm259_vm10, %v2119_v29, 0.0 }
 0x11b   :  { %v2123_v33 = vpop.eup %2122  ;;  %v301_v34 = vsel %vm2268_vm11, %v2121_v31, 0.0 }
 0x11c   :  { %1936 = vmatpush3.msk.msra.mxu1 %vm175_vm4, %v305_v30  ;;  %v2125_v35 = vpop.eup %2124  ;;  %v304_v36 = vmul.f32 %v301_v34, %v277_v32  ;;  %v276_v37 = vsel %vm258_vm12, %v2123_v33, 0.0 }
 0x11d   :  { %1937 = vmatprep.subr.mxu1 %v2142_v1  ;;  %v300_v38 = vsel %vm2272_vm13, %v2125_v35, 0.0 }
 0x11e   :  { %1938 = vmatpush3.msra.mxu1 %v304_v36  ;;  %v303_v39 = vmul.f32 %v300_v38, %v276_v37 }
 0x11f   :  { %1939 = vmatprep.subr.mxu1 %v2142_v1 }
 0x120   :  { %1940 = vmatpush3.msra.mxu1 %v303_v39 }
 0x121   :  { %1942 = vmatmul.mubr.msk.f32.vlgmr.msra.gmra.mxu1 %vm321_vm14, %v316_v40 }
 0x122   :  { %1944 = vmatprep.mubr.msk.f32.mxu1 %vm2143_vm1, %v2142_v1 }
 0x125   :  { %1945 = vmatmul.mubr.msk.f32.gmra.mxu1 %vm321_vm14, %v317_v41 }
 0x126   :  { %1947 = vmatprep.mubr.msk.f32.mxu1 %vm2143_vm1, %v2142_v1 }
 0x129   :  { %1948 = vmatmul.mubr.msk.f32.gmra.mxu1 %vm321_vm14, %v318_v42 }
 0x12a   :  { %1950 = vmatprep.mubr.msk.f32.mxu1 %vm2143_vm1, %v2142_v1 }
 0x12d   :  { %1951 = vmatmul.mubr.msk.f32.gmra.mxu1 %vm321_vm14, %v319_v43 }
 0x12e   :  { %1953 = vmatprep.mubr.msk.f32.mxu1 %vm2143_vm1, %v2142_v1 }
 0x131   :  { %1954 = vmatmul.mubr.msk.f32.gmra.mxu1 %vm321_vm14, %v320_v45 }
 0x132   :  { %1091 = vmatprep.mubr.f32.mxu1 %v1013_v50 }
 0x1e1   :  { %v406_v55 = vpop.f32.mrf.mxu1 }
 0x1e2   :  { %v430_v56 = vmax.f32 %v406_v55, 0.0 }
 0x1e3   :  { %v1943_v57 = vpop.f32.mrf.mxu1 }
 0x1e4   :  { %v487_v59 = vcombine.high %v430_v56, %v430_v56  ;;  %v494_v2 = vrot.slane %v430_v56, %v2327_v58 }
 0x1e5   :  { %v411_v60 = vpop.f32.mrf.mxu1 }
 0x1e6   :  { %v501_v61 = vrot.slane %v487_v59, %v2327_v58  ;;  %v431_v62 = vmax.f32 %v411_v60, 0.0  ;;  %v502_v10 = vcombine.high %v494_v2, %v494_v2  ;;  %v510_v19 = vrot.slane %v494_v2, %v2327_v58 }
 0x1e7   :  { %v1946_v63 = vpop.f32.mrf.mxu1 }
 0x1e8   :  { %v536_v3 = vcombine.high %v431_v62, %v431_v62  ;;  %v503_v7 = vcombine.high %v501_v61, %v501_v61  ;;  %v517_v20 = vrot.slane %v501_v61, %v2327_v58  ;;  %v2340_v23 = vrot.slane %v502_v10, %v2327_v58 }
 0x1e9   :  { %v416_v5 = vpop.f32.mrf.mxu1  ;;  %v543_v24 = vrot.slane %v431_v62, %v2327_v58  ;;  %v532_v31 = vcombine.high %v510_v19, %v510_v19  ;;  %v2352_v37 = vrot.slane %v510_v19, %v2334_v18 }
 0x1ea   :  { %v550_v8 = vrot.slane %v536_v3, %v2327_v58  ;;  %v432_v11 = vmax.f32 %v416_v5, 0.0  ;;  %v531_v14 = vrot.slane %v503_v7, %v2327_v58  ;;  %v533_v32 = vcombine.high %v517_v20, %v517_v20 }
 0x1eb   :  { %v1949_v9 = vpop.f32.mrf.mxu1  ;;  %v534_v36 = vcombine.high %v2340_v23, %v2340_v23  ;;  %v551_v38 = vcombine.high %v543_v24, %v543_v24  ;;  %v2359_v40 = vrot.slane %v2340_v23, %v2334_v18  ;;  %v2362_v41 = vrot.slane %v543_v24, %v2327_v58 }
 0x1ec   :  { %v552_v12 = vcombine.high %v550_v8, %v550_v8  ;;  %v585_v15 = vcombine.high %v432_v11, %v432_v11  ;;  %v2345_v27 = vrot.slane %v550_v8, %v2327_v58  ;;  %v535_v28 = vcombine.high %v531_v14, %v531_v14 }
 0x1ed   :  { %v421_v13 = vpop.f32.mrf.mxu1  ;;  %v592_v29 = vrot.slane %v432_v11, %v2327_v58  ;;  %v2372_v51 = vrot.slane %v532_v31, %v2334_v18  ;;  %v759_v54 = vrot.slane %v533_v32, %v2334_v18  ;;  %v2380_v55 = vrot.slane %v517_v20, %v2334_v18 }
 0x1ee   :  { %v433_v17 = vmax.f32 %v421_v13, 0.0  ;;  %v580_v21 = vrot.slane %v552_v12, %v2327_v58  ;;  %v599_v25 = vrot.slane %v585_v15, %v2327_v58  ;;  %v582_v43 = vcombine.high %v2345_v27, %v2345_v27 }
 0x1ef   :  { %v1952_v22 = vpop.f32.mrf.mxu1  ;;  %v600_v45 = vcombine.high %v592_v29, %v592_v29  ;;  %v2367_v47 = vrot.slane %v592_v29, %v2327_v58  ;;  %v763_v50 = vrot.slane %v535_v28, %v2334_v18  ;;  %v2383_v56 = vrot.slane %v551_v38, %v2327_v58 }
 0x1f0   :  { %v634_v26 = vcombine.high %v433_v17, %v433_v17  ;;  %v601_v30 = vcombine.high %v599_v25, %v599_v25  ;;  %v584_v34 = vcombine.high %v580_v21, %v580_v21  ;;  %v641_v49 = vrot.slane %v433_v17, %v2327_v58 }
 0x1f1   :  { %v426_v4 = vpop.f32.mrf.mxu1  ;;  %v755_v59 = vrot.slane %v531_v14, %v2334_v18  ;;  %v581_v60 = vcombine.high %v2362_v41, %v2362_v41  ;;  %v615_v61 = vrot.slane %v599_v25, %v2327_v58  ;;  %v791_v63 = vrot.slane %v582_v43, %v2334_v18 }
 0x1f2   :  { %v648_v33 = vrot.slane %v634_v26, %v2327_v58  ;;  %v2355_v39 = vrot.slane %v601_v30, %v2327_v58  ;;  %v795_v53 = vrot.slane %v584_v34, %v2334_v18  ;;  %v2394_v2 = vrot.slane %v600_v45, %v2327_v58 }
 0x1f3   :  { %v1955_v35 = vpop.f32.mrf.mxu1  ;;  %v630_v3 = vcombine.high %v2367_v47, %v2367_v47  ;;  %v649_v5 = vcombine.high %v641_v49, %v641_v49  ;;  %v947_v7 = vmul.f32 %v763_v50, %v2318_v48  ;;  %v2399_v8 = vmax.f32 %v426_v4, 0.0 }
 0x1f4   :  { %v650_v42 = vcombine.high %v648_v33, %v648_v33  ;;  %v633_v57 = vcombine.high %v2355_v39, %v2355_v39  ;;  %v963_v62 = vmul.f32 %v795_v53, %v2318_v48  ;;  %v962_v9 = vmul.f32 %v795_v53, %v2316_v46 }
 0x1f5   :  { %v945_v10 = vmul.f32 %v759_v54, %v2318_v48  ;;  %v2406_v12 = vrot.slane %v648_v33, %v2327_v58  ;;  %v946_v13 = vmul.f32 %v763_v50, %v2316_v46  ;;  %v787_v14 = vrot.slane %v580_v21, %v2334_v18 }
 0x1f6   :  { %v2375_v52 = vrot.slane %v650_v42, %v2327_v58  ;;  %1784 = vmatprep.subr.mxu1 %v963_v62  ;;  %v827_v15 = vrot.slane %v633_v57, %v2334_v18  ;;  %v631_v17 = vcombine.high %v615_v61, %v615_v61  ;;  %v2412_v19 = vrot.slane %v641_v49, %v2327_v58 }
 0x1f7   :  { %1785 = vmatpush3.msra.mxu1 %v947_v7  ;;  %v961_v20 = vmul.f32 %v791_v63, %v2318_v48  ;;  %v632_v24 = vcombine.high %v2394_v2, %v2394_v2  ;;  %v2419_v25 = vrot.slane %v630_v3, %v2334_v18  ;;  %v2422_v26 = vrot.slane %v615_v61, %v2334_v18 }
 0x1f8   :  { %v682_v11 = vcombine.high %v2375_v52, %v2375_v52  ;;  %1786 = vmatprep.subr.mxu1 %v962_v9  ;;  %v2425_v21 = vrot.slane %v649_v5, %v2327_v58  ;;  %v683_v4 = vcombine.high %v2399_v8, %v2399_v8  ;;  %v960_v28 = vmul.f32 %v791_v63, %v2316_v46 }
 0x1f9   :  { %1787 = vmatpush3.msra.mxu1 %v946_v13  ;;  %v944_v29 = vmul.f32 %v759_v54, %v2316_v46  ;;  %v959_v31 = vmul.f32 %v787_v14, %v2318_v48  ;;  %v979_v32 = vmul.f32 %v827_v15, %v2318_v48  ;;  %v680_v34 = vcombine.high %v2406_v12, %v2406_v12 }
 0x1fa   :  { %v859_v22 = vrot.slane %v682_v11, %v2334_v18  ;;  %1788 = vmatprep.subr.mxu1 %v961_v20  ;;  %v783_v35 = vrot.slane %v2345_v27, %v2334_v18  ;;  %v823_v38 = vrot.slane %v631_v17, %v2334_v18  ;;  %v583_v42 = vcombine.high %v2383_v56, %v2383_v56 }
 0x1fb   :  { %1789 = vmatpush3.msra.mxu1 %v945_v10  ;;  %v943_v43 = vmul.f32 %v755_v59, %v2318_v48  ;;  %v978_v45 = vmul.f32 %v827_v15, %v2316_v46  ;;  %v855_v49 = vrot.slane %v680_v34, %v2334_v18  ;;  %v679_v50 = vcombine.high %v2412_v19, %v2412_v19 }
 0x1fc   :  { %v995_v30 = vmul.f32 %v859_v22, %v2318_v48  ;;  %v994_v33 = vmul.f32 %v859_v22, %v2316_v46  ;;  %1790 = vmatprep.subr.mxu1 %v960_v28  ;;  %v697_v53 = vrot.slane %v683_v4, %v2327_v58  ;;  %v958_v27 = vmul.f32 %v787_v14, %v2316_v46 }
 0x1fd   :  { %1791 = vmatpush3.msra.mxu1 %v944_v29  ;;  %v942_v54 = vmul.f32 %v755_v59, %v2316_v46  ;;  %v993_v57 = vmul.f32 %v855_v49, %v2318_v48  ;;  %v851_v61 = vrot.slane %v2375_v52, %v2334_v18  ;;  %v957_v62 = vmul.f32 %v783_v35, %v2318_v48 }
 0x1fe   :  { %1825 = vmatprep.subr.mxu0 %v995_v30  ;;  %1792 = vmatprep.subr.mxu1 %v959_v31  ;;  %v977_v63 = vmul.f32 %v823_v38, %v2318_v48  ;;  %v779_v3 = vrot.slane %v583_v42, %v2334_v18  ;;  %v819_v5 = vrot.slane %v2355_v39, %v2334_v18 }
 0x1ff   :  { %1826 = vmatpush3.msra.mxu0 %v979_v32  ;;  %1793 = vmatpush3.msra.mxu1 %v943_v43  ;;  %v941_v59 = vmul.f32 %v2380_v55, %v2318_v48  ;;  %v992_v7 = vmul.f32 %v855_v49, %v2316_v46  ;;  %v747_v52 = vrot.slane %v534_v36, %v2334_v18 }
 0x200   :  { %1827 = vmatprep.subr.mxu0 %v994_v33  ;;  %1794 = vmatprep.subr.mxu1 %v958_v27  ;;  %v956_v9 = vmul.f32 %v783_v35, %v2316_v46  ;;  %v940_v10 = vmul.f32 %v2380_v55, %v2316_v46  ;;  %v976_v39 = vmul.f32 %v823_v38, %v2316_v46 }
 0x201   :  { %1828 = vmatpush3.msra.mxu0 %v978_v45  ;;  %1795 = vmatpush3.msra.mxu1 %v942_v54  ;;  %v991_v11 = vmul.f32 %v851_v61, %v2318_v48  ;;  %v775_v13 = vrot.slane %v581_v60, %v2334_v18  ;;  %v847_v23 = vrot.slane %v2406_v12, %v2334_v18 }
 0x202   :  { %1829 = vmatprep.subr.mxu0 %v993_v57  ;;  %1796 = vmatprep.subr.mxu1 %v957_v62  ;;  %v699_v36 = vcombine.high %v697_v53, %v697_v53  ;;  %v955_v14 = vmul.f32 %v779_v3, %v2318_v48  ;;  %v975_v55 = vmul.f32 %v819_v5, %v2318_v48 }
 0x203   :  { %1830 = vmatpush3.msra.mxu0 %v977_v63  ;;  %1797 = vmatpush3.msra.mxu1 %v941_v59  ;;  %v939_v15 = vmul.f32 %v747_v52, %v2318_v48  ;;  %v954_v17 = vmul.f32 %v779_v3, %v2316_v46  ;;  %v990_v20 = vmul.f32 %v851_v61, %v2316_v46 }
 0x204   :  { %1831 = vmatprep.subr.mxu0 %v992_v7  ;;  %1798 = vmatprep.subr.mxu1 %v956_v9  ;;  %v938_v60 = vmul.f32 %v747_v52, %v2316_v46  ;;  %v974_v12 = vmul.f32 %v819_v5, %v2316_v46  ;;  %v681_v22 = vcombine.high %v2425_v21, %v2425_v21 }
 0x205   :  { %1832 = vmatpush3.msra.mxu0 %v976_v39  ;;  %1799 = vmatpush3.msra.mxu1 %v940_v10  ;;  %v953_v4 = vmul.f32 %v775_v13, %v2318_v48  ;;  %v989_v28 = vmul.f32 %v847_v23, %v2318_v48  ;;  %v973_v29 = vmul.f32 %v2422_v26, %v2318_v48 }
 0x206   :  { %1833 = vmatprep.subr.mxu0 %v991_v11  ;;  %1800 = vmatprep.subr.mxu1 %v955_v14  ;;  %v771_v30 = vrot.slane %v2383_v56, %v2334_v18  ;;  %v843_v31 = vrot.slane %v681_v22, %v2334_v18  ;;  %v811_v32 = vrot.slane %v632_v24, %v2334_v18  ;;  %v1012_v11 = vld [vmem:[%s2861_s6] sm:$0xff] }
 0x207   :  { %1834 = vmatpush3.msra.mxu0 %v975_v55  ;;  %1801 = vmatpush3.msra.mxu1 %v939_v15  ;;  %v2497_v33 = vrot.slane %v699_v36, %v2327_v58  ;;  %v937_v34 = vmul.f32 %v2372_v51, %v2318_v48  ;;  %v988_v35 = vmul.f32 %v847_v23, %v2316_v46 }
 0x208   :  { %1835 = vmatprep.subr.mxu0 %v990_v20  ;;  %1802 = vmatprep.subr.mxu1 %v954_v17  ;;  %v2503_v38 = vrot.slane %v697_v53, %v2327_v58  ;;  %v952_v56 = vmul.f32 %v775_v13, %v2316_v46  ;;  %v972_v24 = vmul.f32 %v2422_v26, %v2316_v46 }
 0x209   :  { %1836 = vmatpush3.msra.mxu0 %v974_v12  ;;  %1803 = vmatpush3.msra.mxu1 %v938_v60  ;;  %v936_v42 = vmul.f32 %v2372_v51, %v2316_v46  ;;  %v987_v43 = vmul.f32 %v843_v31, %v2318_v48  ;;  %v839_v45 = vrot.slane %v679_v50, %v2334_v18 }
 0x20a   :  { %1837 = vmatprep.subr.mxu0 %v989_v28  ;;  %1804 = vmatprep.subr.mxu1 %v953_v4  ;;  %v951_v49 = vmul.f32 %v771_v30, %v2318_v48  ;;  %v971_v53 = vmul.f32 %v811_v32, %v2318_v48  ;;  %v767_v26 = vrot.slane %v2362_v41, %v2334_v18  ;;  %v1014_v28 = vld [vmem:[%s2861_s6 + $0x10] sm:$0xff] }
 0x20b   :  { %1838 = vmatpush3.msra.mxu0 %v973_v29  ;;  %1805 = vmatpush3.msra.mxu1 %v937_v34  ;;  %v731_v27 = vcombine.high %v2497_v33, %v2497_v33  ;;  %v935_v51 = vmul.f32 %v2359_v40, %v2318_v48  ;;  %v986_v54 = vmul.f32 %v843_v31, %v2316_v46 }
 0x20c   :  { %1839 = vmatprep.subr.mxu0 %v988_v35  ;;  %1806 = vmatprep.subr.mxu1 %v952_v56  ;;  %v803_v50 = vrot.slane %v2394_v2, %v2334_v18  ;;  %v950_v57 = vmul.f32 %v771_v30, %v2316_v46  ;;  %v970_v61 = vmul.f32 %v811_v32, %v2316_v46  ;;  %v1018_v30 = vld [vmem:[%s2861_s6 + $0x30] sm:$0xff]  ;;  %v1020_v32 = vld [vmem:[%s2861_s6 + $0x40] sm:$0xff]  ;;  %v1017_v56 = vld [vmem:[%s2861_s6 + $0x28] sm:$0xff] }
 0x20d   :  { %1840 = vmatpush3.msra.mxu0 %v972_v24  ;;  %1807 = vmatpush3.msra.mxu1 %v936_v42  ;;  %v934_v41 = vmul.f32 %v2359_v40, %v2316_v46  ;;  %v985_v62 = vmul.f32 %v839_v45, %v2318_v48  ;;  %v835_v63 = vrot.slane %v2425_v21, %v2334_v18  ;;  %v1019_v24 = vld [vmem:[%s2861_s6 + $0x38] sm:$0xff] }
 0x20e   :  { %1841 = vmatprep.subr.mxu0 %v987_v43  ;;  %1808 = vmatprep.subr.mxu1 %v951_v49  ;;  %v729_v3 = vcombine.high %v2503_v38, %v2503_v38  ;;  %v949_v2 = vmul.f32 %v767_v26, %v2318_v48  ;;  %v969_v5 = vmul.f32 %v2419_v25, %v2318_v48 }
 0x20f   :  { %1842 = vmatpush3.msra.mxu0 %v971_v53  ;;  %1809 = vmatpush3.msra.mxu1 %v935_v51  ;;  %v933_v40 = vmul.f32 %v2352_v37, %v2318_v48  ;;  %v984_v59 = vmul.f32 %v839_v45, %v2316_v46  ;;  %v891_v7 = vrot.slane %v731_v27, %v2334_v18  ;;  %v1025_v45 = vld [vmem:[%s2861_s6 + $0x68] sm:$0xff]  ;;  %v1024_v53 = vld [vmem:[%s2861_s6 + $0x60] sm:$0xff]  ;;  %v1022_v27 = vld [vmem:[%s2861_s6 + $0x50] sm:$0xff] }
 0x210   :  { %1843 = vmatprep.subr.mxu0 %v986_v54  ;;  %1810 = vmatprep.subr.mxu1 %v950_v57  ;;  %v690_v21 = vrot.slane %v2399_v8, %v2327_v58  ;;  %v948_v52 = vmul.f32 %v767_v26, %v2316_v46  ;;  %v968_v9 = vmul.f32 %v2419_v25, %v2316_v46 }
 0x211   :  { %1844 = vmatpush3.msra.mxu0 %v970_v61  ;;  %1811 = vmatpush3.msra.mxu1 %v934_v41  ;;  %v932_v10 = vmul.f32 %v2352_v37, %v2316_v46  ;;  %v983_v39 = vmul.f32 %v835_v63, %v2318_v48  ;;  %v799_v8 = vrot.slane %v2367_v47, %v2334_v18 }
 0x212   :  { %1845 = vmatprep.subr.mxu0 %v985_v62  ;;  %1812 = vmatprep.subr.mxu1 %v949_v2  ;;  %v831_v13 = vrot.slane %v2412_v19, %v2334_v18  ;;  %v967_v25 = vmul.f32 %v803_v50, %v2318_v48  ;;  %v1011_v37 = vmul.f32 %v891_v7, %v2318_v48 }
 0x213   :  { %1846 = vmatpush3.msra.mxu0 %v969_v5  ;;  %1813 = vmatpush3.msra.mxu1 %v933_v40  ;;  %v887_v23 = vrot.slane %v729_v3, %v2334_v18  ;;  %v698_v36 = vcombine.high %v690_v21, %v690_v21  ;;  %v982_v14 = vmul.f32 %v835_v63, %v2316_v46  ;;  %v1016_v5 = vld [vmem:[%s2861_s6 + $0x20] sm:$0xff]  ;;  %v2145_v40 = vmov 0  }
 0x214   :  { %1847 = vmatprep.subr.mxu0 %v984_v59  ;;  %1814 = vmatprep.subr.mxu1 %v948_v52  ;;  %v966_v47 = vmul.f32 %v803_v50, %v2316_v46  ;;  %v1010_v19 = vmul.f32 %v891_v7, %v2316_v46  ;;  %v981_v55 = vmul.f32 %v831_v13, %v2318_v48  ;;  %v65_v59 = vld [vmem:[%s2862_s2 + $0x78] sm:$0xff]  ;;  %v63_v7 = vld [vmem:[%s2862_s2 + $0x68] sm:$0xff]  ;;  %v62_v52 = vld [vmem:[%s2862_s2 + $0x60] sm:$0xff] }
 0x215   :  { %1848 = vmatpush3.msra.mxu0 %v968_v9  ;;  %1815 = vmatpush3.msra.mxu1 %v932_v10  ;;  %v965_v15 = vmul.f32 %v799_v8, %v2318_v48  ;;  %v1009_v17 = vmul.f32 %v887_v23, %v2318_v48  ;;  %v883_v20 = vrot.slane %v2497_v33, %v2334_v18  ;;  %v61_v9 = vld [vmem:[%s2862_s2 + $0x58] sm:$0xff]  ;;  %v60_v10 = vld [vmem:[%s2862_s2 + $0x50] sm:$0xff] }
 0x216   :  { %1849 = vmatprep.subr.mxu0 %v983_v39  ;;  %1962 = vmatprep.subr.mxu1 %v2142_v1  ;;  %v720_v60 = vrot.slane %v698_v36, %v2327_v58  ;;  %v980_v12 = vmul.f32 %v831_v13, %v2316_v46  ;;  %v964_v22 = vmul.f32 %v799_v8, %v2316_v46  ;;  %v59_v39 = vld [vmem:[%s2862_s2 + $0x48] sm:$0xff]  ;;  %v57_v8 = vld [vmem:[%s2862_s2 + $0x38] sm:$0xff]  ;;  %v56_v13 = vld [vmem:[%s2862_s2 + $0x30] sm:$0xff] }
 0x217   :  { %1092 = vmatmul.mubr.f32.vlgmr.msra.gmra.mxu1 %v1012_v11  ;;  %1850 = vmatpush3.msra.mxu0 %v967_v25  ;;  %v1008_v4 = vmul.f32 %v887_v23, %v2316_v46  ;;  %v83_v29 = vpack.c.bf16 %v2230_v6, %v2230_v6  ;;  %v1007_v31 = vmul.f32 %v883_v20, %v2318_v48  ;;  %v58_v11 = vld [vmem:[%s2862_s2 + $0x40] sm:$0xff]  ;;  %v55_v25 = vld [vmem:[%s2862_s2 + $0x28] sm:$0xff]  ;;  %v53_v23 = vld [vmem:[%s2862_s2 + $0x18] sm:$0xff] }
 0x218   :  { %1963 = vmatpush3.msra.mxu1 %v1011_v37  ;;  %1851 = vmatprep.subr.mxu0 %v982_v14  ;;  %v706_v33 = vrot.slane %v690_v21, %v2327_v58  ;;  %v730_v34 = vcombine.high %v720_v60, %v720_v60  ;;  %v879_v6 = vrot.slane %v2503_v38, %v2334_v18  ;;  %v1023_v38 = vld [vmem:[%s2861_s6 + $0x58] sm:$0xff]  ;;  %v64_v21 = vld [vmem:[%s2862_s2 + $0x70] sm:$0xff]  ;;  %v54_v37 = vld [vmem:[%s2862_s2 + $0x20] sm:$0xff] }
 0x219   :  { %1964 = vmatprep.subr.mxu1 %v2142_v1  ;;  %1852 = vmatpush3.msra.mxu0 %v966_v47  ;;  %v1006_v35 = vmul.f32 %v883_v20, %v2316_v46  ;;  %v1268_v58 = vsel %vm175_vm4, %v83_v29, 0  ;;  %v867_v57 = vrot.slane %v720_v60, %v2334_v18  ;;  %v52_v36 = vld [vmem:[%s2862_s2 + $0x10] sm:$0xff]  ;;  %v51_v14 = vld [vmem:[%s2862_s2 + $0x8] sm:$0xff]  ;;  %v50_v47 = vld [vmem:[%s2862_s2] sm:$0xff] }
 0x21a   :  { %1965 = vmatpush3.msra.mxu1 %v1010_v19  ;;  %1853 = vmatprep.subr.mxu0 %v981_v55  ;;  %v728_v42 = vcombine.high %v706_v33, %v706_v33  ;;  %v1005_v43 = vmul.f32 %v879_v6, %v2318_v48  ;;  %v875_v49 = vrot.slane %v730_v34, %v2334_v18 }
 0x21b   :  { %1966 = vmatprep.subr.mxu1 %v2142_v1  ;;  %1854 = vmatpush3.msra.mxu0 %v965_v15  ;;  %v1004_v26 = vmul.f32 %v879_v6, %v2316_v46  ;;  %v863_v62 = vrot.slane %v706_v33, %v2334_v18  ;;  %v999_v63 = vmul.f32 %v867_v57, %v2318_v48 }
 0x21c   :  { %1967 = vmatpush3.msra.mxu1 %v1009_v17  ;;  %1855 = vmatprep.subr.mxu0 %v980_v12  ;;  %v871_v51 = vrot.slane %v728_v42, %v2334_v18  ;;  %v1003_v54 = vmul.f32 %v875_v49, %v2318_v48  ;;  %v1002_v50 = vmul.f32 %v875_v49, %v2316_v46 }
 0x21d   :  { %1968 = vmatprep.subr.mxu1 %v2142_v1  ;;  %1856 = vmatpush3.msra.mxu0 %v964_v22  ;;  %v997_v3 = vmul.f32 %v863_v62, %v2318_v48  ;;  %v996_v2 = vmul.f32 %v863_v62, %v2316_v46 }
 0x21e   :  { %1969 = vmatpush3.msra.mxu1 %v1008_v4  ;;  %1172 = vmatmul.mubr.f32.vlgmr.msra.gmra.mxu0 %v1014_v28  ;;  %v1001_v61 = vmul.f32 %v871_v51, %v2318_v48  ;;  %v1000_v41 = vmul.f32 %v871_v51, %v2316_v46  ;;  %v1021_v48 = vld [vmem:[%s2861_s6 + $0x48] sm:$0xff]  ;;  %v2719_v51 = vand.u32 127, %v66_v0 }
 0x21f   :  { %1970 = vmatprep.subr.mxu1 %v2142_v1  ;;  %1096 = vmatprep.mubr.f32.mxu1 %v1018_v30 }
 0x220   :  { %1971 = vmatpush3.msra.mxu1 %v1007_v31  ;;  %1176 = vmatprep.mubr.f32.mxu0 %v1020_v32 }
 0x221   :  { %1972 = vmatprep.subr.mxu1 %v2142_v1  ;;  %2003 = vmatprep.subr.bf16.mxu0 %v2142_v1 }
 0x222   :  { %1973 = vmatpush3.msra.mxu1 %v1006_v35  ;;  %1177 = vmatmul.mubr.f32.gmra.mxu0 %v1019_v24 }
 0x223   :  { %1097 = vmatmul.mubr.f32.gmra.mxu1 %v1017_v56  ;;  %1974 = vmatprep.subr.mxu1 %v2142_v1 }
 0x224   :  { %2004 = vmatpush3.bf16.msra.mxu0 %v1268_v58  ;;  %1975 = vmatpush3.msra.mxu1 %v1005_v43 }
 0x225   :  { %1101 = vmatprep.mubr.f32.mxu1 %v1023_v38  ;;  %1976 = vmatprep.subr.mxu1 %v2142_v1 }
 0x226   :  { %1181 = vmatprep.mubr.f32.mxu0 %v1025_v45  ;;  %1977 = vmatpush3.msra.mxu1 %v1004_v26  ;;  %v1311_v45 = vld [vmem:[%s2863_s7] sm:$0xff] }
 0x227   :  { %1182 = vmatmul.mubr.f32.gmra.mxu0 %v1024_v53  ;;  %1102 = vmatmul.mubr.f32.gmra.mxu1 %v1022_v27 }
 0x228   :  { %1978 = vmatprep.subr.mxu1 %v2142_v1  ;;  %2005 = vmatprep.mubr.msk.bf16.mxu0 %vm2143_vm1, %v2142_v1 }
 0x229   :  { %1979 = vmatpush3.msra.mxu1 %v1003_v54  ;;  %1994 = vmatprep.mubr.msk.f32.mxu1 %vm2143_vm1, %v2142_v1 }
 0x22a   :  { %1980 = vmatprep.subr.mxu1 %v2142_v1  ;;  %2009 = vmatprep.subr.mxu0 %v2142_v1 }
 0x22b   :  { %1981 = vmatpush3.msra.mxu1 %v1002_v50  ;;  %2006 = vmatmul.mubr.msk.bf16.vlgmr.msra.gmra.mxu0 %vm45_vm0, %v2248_v16  ;;  %v998_v16 = vmul.f32 %v867_v57, %v2316_v46  ;;  %v1026_v46 = vld [vmem:[%s2861_s6 + $0x70] sm:$0xff] }
 0x22c   :  { %1982 = vmatprep.subr.mxu1 %v2142_v1  ;;  %2013 = vmatprep.mubr.msk.f32.mxu0 %vm2143_vm1, %v2142_v1 }
 0x22d   :  { %1983 = vmatpush3.msra.mxu1 %v1001_v61  ;;  %2098 = vset.pattern.permute.xlu0 %v2145_v40 }
 0x22e   :  { %1984 = vmatprep.subr.mxu1 %v2142_v1  ;;  %2099 = vset.pattern.permute.xlu1 %v2145_v40 }
 0x22f   :  { %1985 = vmatpush3.msra.mxu1 %v1000_v41  ;;  %132 = vperm.xlu0 %2098, %v65_v59  }
 0x230   :  { %1986 = vmatprep.subr.mxu1 %v2142_v1  ;;  %126 = vperm.xlu1 %2099, %v63_v7  }
 0x231   :  { %1987 = vmatpush3.msra.mxu1 %v999_v63  ;;  %v2146_v63 = vmov 1.0  }
 0x232   :  { %1988 = vmatprep.subr.mxu1 %v2142_v1 }
 0x233   :  { %1989 = vmatpush3.msra.mxu1 %v998_v16  ;;  %129 = vperm.xlu0 %2098, %v64_v21  }
 0x234   :  { %1990 = vmatprep.subr.mxu1 %v2142_v1  ;;  %123 = vperm.xlu1 %2099, %v62_v52  }
 0x235   :  { %1991 = vmatpush3.msra.mxu1 %v997_v3 }
 0x236   :  { %1992 = vmatprep.subr.mxu1 %v2142_v1 }
 0x237   :  { %1993 = vmatpush3.msra.mxu1 %v996_v2  ;;  %120 = vperm.xlu0 %2098, %v61_v9  }
 0x238   :  { %1995 = vmatmul.mubr.f32.vlgmr.msra.gmra.mxu1 %v1016_v5  ;;  %117 = vperm.xlu1 %2099, %v60_v10  }
 0x239   :  { %1997 = vmatprep.mubr.msk.f32.mxu1 %vm2143_vm1, %v2142_v1 }
 0x23b   :  { %114 = vperm.xlu0 %2098, %v59_v39  }
 0x23c   :  { %1998 = vmatmul.mubr.f32.gmra.mxu1 %v1021_v48  ;;  %111 = vperm.xlu1 %2099, %v58_v11  }
 0x23d   :  { %2000 = vmatprep.mubr.msk.f32.mxu1 %vm2143_vm1, %v2142_v1 }
 0x23f   :  { %108 = vperm.xlu0 %2098, %v57_v8   ;;  %v2140_v8 = vld [vmem:[%s2859_s4 + $0x8] sm:$0xff] }
 0x240   :  { %2001 = vmatmul.mubr.f32.gmra.mxu1 %v1026_v46  ;;  %105 = vperm.xlu1 %2099, %v56_v13   ;;  %v306_v13 = vmul.f32 0.6666667, %v2255_v44 }
 0x243   :  { %102 = vperm.xlu0 %2098, %v55_v25   ;;  %v307_v25 = vsub.f32 1.0, %v306_v13 }
 0x244   :  { %99 = vperm.xlu1 %2099, %v54_v37  }
 0x245   :  { %v308_v37 = vmul.f32 10.0, %v307_v25 }
 0x247   :  { %96 = vperm.xlu0 %2098, %v53_v23  }
 0x248   :  { %93 = vperm.xlu1 %2099, %v52_v36  }
 0x24b   :  { %90 = vperm.xlu0 %2098, %v51_v14  }
 0x24c   :  { %87 = vperm.xlu1 %2099, %v50_v47  }
 0x2aa   :  { %v133_v61 = vpop.permute.xlu0 %132 }
 0x2ab   :  { %vm149_vm2 = vcmp.eq.s32.totalorder %v2719_v51, %v133_v61  ;;  %v127_v41 = vpop.permute.xlu1 %126 }
 0x2ac   :  { %2051 = vmatprep.subr.msk.mxu1 %vm149_vm2, %v2146_v63  ;;  %vm147_vm3 = vcmp.eq.s32.totalorder %v2719_v51, %v127_v41  ;;  %v1479_v41 = vld [vmem:[#allocation3] sm:$0xff] }
 0x2ad   :  { %2052 = vmatpush3.msk.msra.mxu1 %vm149_vm2, %v2146_v63 }
 0x2ae   :  { %v130_v0 = vpop.permute.xlu0 %129 }
 0x2af   :  { %v124_v2 = vpop.permute.xlu1 %123 }
 0x2b0   :  { %vm146_vm4 = vcmp.eq.s32.totalorder %v2719_v51, %v124_v2 }
 0x2b2   :  { %v121_v5 = vpop.permute.xlu0 %120 }
 0x2b3   :  { %vm145_vm5 = vcmp.eq.s32.totalorder %v2719_v51, %v121_v5  ;;  %v118_v48 = vpop.permute.xlu1 %117 }
 0x2b4   :  { %vm144_vm6 = vcmp.eq.s32.totalorder %v2719_v51, %v118_v48 }
 0x2b6   :  { %v115_v46 = vpop.permute.xlu0 %114 }
 0x2b7   :  { %vm143_vm7 = vcmp.eq.s32.totalorder %v2719_v51, %v115_v46  ;;  %v112_v40 = vpop.permute.xlu1 %111 }
 0x2b8   :  { %vm142_vm8 = vcmp.eq.s32.totalorder %v2719_v51, %v112_v40 }
 0x2ba   :  { %v109_v59 = vpop.permute.xlu0 %108 }
 0x2bb   :  { %vm141_vm9 = vcmp.eq.s32.totalorder %v2719_v51, %v109_v59  ;;  %v106_v7 = vpop.permute.xlu1 %105 }
 0x2bc   :  { %vm140_vm10 = vcmp.eq.s32.totalorder %v2719_v51, %v106_v7 }
 0x2be   :  { %v103_v21 = vpop.permute.xlu0 %102 }
 0x2bf   :  { %vm139_vm11 = vcmp.eq.s32.totalorder %v2719_v51, %v103_v21  ;;  %v100_v52 = vpop.permute.xlu1 %99 }
 0x2c0   :  { %vm138_vm12 = vcmp.eq.s32.totalorder %v2719_v51, %v100_v52 }
 0x2c2   :  { %v97_v9 = vpop.permute.xlu0 %96 }
 0x2c3   :  { %vm137_vm13 = vcmp.eq.s32.totalorder %v2719_v51, %v97_v9  ;;  %v94_v10 = vpop.permute.xlu1 %93  ;;  %v1691_v9 = vld [vmem:[%s2865_s9] sm:$0xff] }
 0x2c4   :  { %vm136_vm14 = vcmp.eq.s32.totalorder %v2719_v51, %v94_v10  ;;  %v1706_v10 = vld [vmem:[%s2866_s10 + $0x8] sm:$0xff] }
 0x2c6   :  { %v91_v39 = vpop.permute.xlu0 %90 }
 0x2c7   :  { %v88_v11 = vpop.permute.xlu1 %87 }
 0x2d7   :  { %v1816_v19 = vpop.f32.mrf.mxu1 }
 0x2d9   :  { %v1817_v55 = vpop.f32.mrf.mxu1 }
 0x2da   :  { %v1818_v15 = vadd.f32 %v1817_v55, %v1816_v19 }
 0x2de   :  { %v1857_v17 = vpop.f32.mrf.mxu0 }
 0x2e0   :  { %v1858_v20 = vpop.f32.mrf.mxu0 }
 0x2e1   :  { %v1859_v60 = vadd.f32 %v1858_v20, %v1857_v17 }
 0x2e2   :  { %v1860_v22 = vpop.f32.mrf.mxu0 }
 0x2e3   :  { %v1819_v12 = vpop.f32.mrf.mxu1  ;;  %v1174_v4 = vadd.f32 %v1859_v60, %v1818_v15 }
 0x2e4   :  { %v1861_v29 = vpop.f32.mrf.mxu0 }
 0x2e5   :  { %v1820_v28 = vpop.f32.mrf.mxu1  ;;  %v1862_v31 = vadd.f32 %v1861_v29, %v1860_v22 }
 0x2e6   :  { %v1821_v30 = vadd.f32 %v1820_v28, %v1819_v12 }
 0x2e7   :  { %v1863_v32 = vpop.f32.mrf.mxu0  ;;  %v1822_v33 = vpop.f32.mrf.mxu1 }
 0x2e8   :  { %v1179_v34 = vadd.f32 %v1862_v31, %v1821_v30 }
 0x2e9   :  { %v1864_v6 = vpop.f32.mrf.mxu0  ;;  %v1823_v35 = vpop.f32.mrf.mxu1 }
 0x2ea   :  { %v1865_v56 = vadd.f32 %v1864_v6, %v1863_v32  ;;  %v1824_v24 = vadd.f32 %v1823_v35, %v1822_v33  ;;  %v1579_v35 = vld [vmem:[%s2864_s8] sm:$0xff] }
 0x2eb   :  { %v1304_v58 = vpop.f32.mrf.mxu0 }
 0x2ec   :  { %v1184_v42 = vadd.f32 %v1865_v56, %v1824_v24  ;;  %v1580_v56 = vld [vmem:[%s2864_s8 + $0x8] sm:$0xff] }
 0x2ed   :  { %v2007_v38 = vpop.f32.mrf.mxu0 }
 0x2ef   :  { %v1307_v43 = vpop.f32.mrf.mxu0 }
 0x2f0   :  { %2010 = vmatpush3.msra.mxu0 %v1307_v43 }
 0x2f1   :  { %v2008_v49 = vpop.f32.mrf.mxu0  ;;  %2011 = vmatprep.subr.mxu0 %v2142_v1 }
 0x2f2   :  { %2012 = vmatpush3.msra.mxu0 %v1304_v58 }
 0x2f3   :  { %2014 = vmatmul.mubr.msk.f32.vlgmr.msra.gmra.mxu0 %vm1312_vm15, %v1311_v45  ;;  %2016 = vmatprep.subr.mxu0 %v2142_v1 }
 0x2f4   :  { %2048 = vmatprep.mubr.msk.f32.mxu0 %vm2143_vm1, %v2142_v1  ;;  %2017 = vmatpush3.msk.msra.mxu0 %vm149_vm2, %v2146_v63  ;;  %vm148_vm1 = vcmp.eq.s32.totalorder %v2719_v51, %v130_v0  ;;  %vm135_vm2 = vcmp.eq.s32.totalorder %v2719_v51, %v91_v39 }
 0x2f5   :  { %2018 = vmatprep.subr.mxu0 %v2142_v1  ;;  %2053 = vmatprep.subr.msk.mxu1 %vm148_vm1, %v2146_v63 }
 0x2f6   :  { %2019 = vmatpush3.msk.msra.mxu0 %vm148_vm1, %v2146_v63  ;;  %2054 = vmatpush3.msk.msra.mxu1 %vm148_vm1, %v2146_v63  ;;  %vm134_vm1 = vcmp.eq.s32.totalorder %v2719_v51, %v88_v11 }
 0x2f7   :  { %2020 = vmatprep.subr.mxu0 %v2142_v1  ;;  %2055 = vmatprep.subr.msk.mxu1 %vm147_vm3, %v2146_v63 }
 0x2f8   :  { %v1253_v53 = vpop.f32.mrf.mxu1  ;;  %2021 = vmatpush3.msk.msra.mxu0 %vm147_vm3, %v2146_v63  ;;  %2056 = vmatpush3.msk.msra.mxu1 %vm147_vm3, %v2146_v63  ;;  %vm43_vm3 = vcmask 57344  }
 0x2f9   :  { %v2716_v26 = vadd.f32 %v1253_v53, %v1174_v4  ;;  %2022 = vmatprep.subr.mxu0 %v2142_v1  ;;  %2057 = vmatprep.subr.msk.mxu1 %vm146_vm4, %v2146_v63  ;;  %44 = vst.msk [vmem:[#allocation2] sm:$0x1] %vm43_vm3, %v2142_v1 }
 0x2fa   :  { %v1996_v27 = vpop.f32.mrf.mxu1  ;;  %2023 = vmatpush3.msk.msra.mxu0 %vm146_vm4, %v2146_v63  ;;  %2058 = vmatpush3.msk.msra.mxu1 %vm146_vm4, %v2146_v63  ;;  %vm309_vm4 = vcmp.gt.f32.partialorder %v308_v37, 0.0 }
 0x2fb   :  { %2024 = vmatprep.subr.mxu0 %v2142_v1  ;;  %2059 = vmatprep.subr.msk.mxu1 %vm145_vm5, %v2146_v63  ;;  %v310_v23 = vsel %vm309_vm4, %v308_v37, 1.0 }
 0x2fc   :  { %v1258_v54 = vpop.f32.mrf.mxu1  ;;  %2025 = vmatpush3.msk.msra.mxu0 %vm145_vm5, %v2146_v63  ;;  %2060 = vmatpush3.msk.msra.mxu1 %vm145_vm5, %v2146_v63  ;;  %2126 = vrcp.f32 %v310_v23  ;;  %vm235_vm5 = vcmp.le.f32.partialorder %v2255_v44, 1.5 }
 0x2fd   :  { %v2721_v50 = vadd.f32 %v1258_v54, %v1179_v34  ;;  %2026 = vmatprep.subr.mxu0 %v2142_v1  ;;  %2061 = vmatprep.subr.msk.mxu1 %vm144_vm6, %v2146_v63  ;;  %v1728_v32 = vsel %vm235_vm5, 1.0, %v2142_v1 }
 0x2fe   :  { %v1999_v57 = vpop.f32.mrf.mxu1  ;;  %2027 = vmatpush3.msk.msra.mxu0 %vm144_vm6, %v2146_v63  ;;  %2062 = vmatpush3.msk.msra.mxu1 %vm144_vm6, %v2146_v63 }
 0x2ff   :  { %2028 = vmatprep.subr.mxu0 %v2142_v1  ;;  %2063 = vmatprep.subr.msk.mxu1 %vm143_vm7, %v2146_v63  ;;  %v1480_v57 = vld [vmem:[#allocation3 + $0x8] sm:$0xff] }
 0x300   :  { %v1263_v62 = vpop.f32.mrf.mxu1  ;;  %2029 = vmatpush3.msk.msra.mxu0 %vm143_vm7, %v2146_v63  ;;  %2064 = vmatpush3.msk.msra.mxu1 %vm143_vm7, %v2146_v63  ;;  %v1405_v49 = vld [vmem:[#allocation2] sm:$0x1] }
 0x301   :  { %v2726_v16 = vadd.f32 %v1263_v62, %v1184_v42  ;;  %2030 = vmatprep.subr.mxu0 %v2142_v1  ;;  %2065 = vmatprep.subr.msk.mxu1 %vm142_vm8, %v2146_v63 }
 0x302   :  { %v2002_v3 = vpop.f32.mrf.mxu1  ;;  %2031 = vmatpush3.msk.msra.mxu0 %vm142_vm8, %v2146_v63  ;;  %2066 = vmatpush3.msk.msra.mxu1 %vm142_vm8, %v2146_v63 }
 0x303   :  { %2032 = vmatprep.subr.mxu0 %v2142_v1  ;;  %2067 = vmatprep.subr.msk.mxu1 %vm141_vm9, %v2146_v63 }
 0x304   :  { %2033 = vmatpush3.msk.msra.mxu0 %vm141_vm9, %v2146_v63  ;;  %2068 = vmatpush3.msk.msra.mxu1 %vm141_vm9, %v2146_v63 }
 0x305   :  { %2034 = vmatprep.subr.mxu0 %v2142_v1  ;;  %2069 = vmatprep.subr.msk.mxu1 %vm140_vm10, %v2146_v63 }
 0x306   :  { %2035 = vmatpush3.msk.msra.mxu0 %vm140_vm10, %v2146_v63  ;;  %2070 = vmatpush3.msk.msra.mxu1 %vm140_vm10, %v2146_v63 }
 0x307   :  { %2036 = vmatprep.subr.mxu0 %v2142_v1  ;;  %2071 = vmatprep.subr.msk.mxu1 %vm139_vm11, %v2146_v63 }
 0x308   :  { %2037 = vmatpush3.msk.msra.mxu0 %vm139_vm11, %v2146_v63  ;;  %2072 = vmatpush3.msk.msra.mxu1 %vm139_vm11, %v2146_v63 }
 0x309   :  { %2038 = vmatprep.subr.mxu0 %v2142_v1  ;;  %2073 = vmatprep.subr.msk.mxu1 %vm138_vm12, %v2146_v63  ;;  %v2127_v14 = vpop.eup %2126 }
 0x30a   :  { %2039 = vmatpush3.msk.msra.mxu0 %vm138_vm12, %v2146_v63  ;;  %2074 = vmatpush3.msk.msra.mxu1 %vm138_vm12, %v2146_v63  ;;  %v312_v15 = vmul.f32 -1.0, %v2127_v14 }
 0x30b   :  { %2040 = vmatprep.subr.mxu0 %v2142_v1  ;;  %2075 = vmatprep.subr.msk.mxu1 %vm137_vm13, %v2146_v63 }
 0x30c   :  { %2041 = vmatpush3.msk.msra.mxu0 %vm137_vm13, %v2146_v63  ;;  %2076 = vmatpush3.msk.msra.mxu1 %vm137_vm13, %v2146_v63  ;;  %v313_v60 = vmul.f32 1.442695, %v312_v15 }
 0x30d   :  { %2042 = vmatprep.subr.mxu0 %v2142_v1  ;;  %2077 = vmatprep.subr.msk.mxu1 %vm136_vm14, %v2146_v63 }
 0x30e   :  { %2043 = vmatpush3.msk.msra.mxu0 %vm136_vm14, %v2146_v63  ;;  %2078 = vmatpush3.msk.msra.mxu1 %vm136_vm14, %v2146_v63  ;;  %2128 = vpow2.f32 %v313_v60 }
 0x30f   :  { %2044 = vmatprep.subr.mxu0 %v2142_v1  ;;  %2079 = vmatprep.subr.msk.mxu1 %vm135_vm2, %v2146_v63 }
 0x310   :  { %2045 = vmatpush3.msk.msra.mxu0 %vm135_vm2, %v2146_v63  ;;  %2080 = vmatpush3.msk.msra.mxu1 %vm135_vm2, %v2146_v63 }
 0x311   :  { %2046 = vmatprep.subr.mxu0 %v2142_v1  ;;  %2081 = vmatprep.subr.msk.mxu1 %vm134_vm1, %v2146_v63  ;;  %v2141_v1 = vld [vmem:[%s2859_s4] sm:$0xff] }
 0x312   :  { %2047 = vmatpush3.msk.msra.mxu0 %vm134_vm1, %v2146_v63  ;;  %2082 = vmatpush3.msk.msra.mxu1 %vm134_vm1, %v2146_v63 }
 0x313   :  { %2086 = vmatprep.subr.mxu0 %v2140_v8 }
 0x31b   :  { %v2129_v30 = vpop.eup %2128 }
 0x31c   :  { %v315_v31 = vsel %vm309_vm4, %v2129_v30, 0.0 }
 0x31d   :  { %v1393_v33 = vmul.f32 %v1728_v32, %v315_v31 }
 0x3b3   :  { %v1382_v36 = vpop.f32.mrf.mxu0 }
 0x3b4   :  { %v1386_v47 = vmul.f32 %v1382_v36, %v2716_v26 }
 0x3b5   :  { %v2015_v19 = vpop.f32.mrf.mxu0 }
 0x3b6   :  { %v1387_v55 = vrot.slane %v1386_v47, 4  ;;  %v1692_v19 = vld [vmem:[%s2865_s9 + $0x8] sm:$0xff] }
 0x3b8   :  { %v1388_v17 = vadd.f32 %v1387_v55, %v1386_v47 }
 0x3ba   :  { %v1389_v20 = vrot.slane %v1388_v17, 2 }
 0x3bc   :  { %v1390_v12 = vadd.f32 %v1389_v20, %v1388_v17 }
 0x3be   :  { %v1391_v22 = vrot.slane %v1390_v12, 1 }
 0x3c0   :  { %v1392_v4 = vadd.f32 %v1391_v22, %v1390_v12 }
 0x3c2   :  { %v1394_v28 = vmin.f32 %v1392_v4, 60.0 }
 0x3c4   :  { %v1395_v29 = vmul.f32 1.442695, %v1394_v28 }
 0x3c6   :  { %2130 = vpow2.f32 %v1395_v29 }
 0x3d3   :  { %v2131_v34 = vpop.eup %2130 }
 0x3d4   :  { %v1397_v6 = vmul.f32 %v2131_v34, %v1393_v33 }
 0x3d6   :  { %2049 = vmatmul.mubr.f32.vlgmr.msra.gmra.mxu0 %v1397_v6  ;;  %2132 = vrsqrt.f32 %v1397_v6  ;;  %vm1400_vm6 = vcmp.eq.f32.partialorder %v1397_v6, inf  ;;  %v1403_v58 = vand.u32 2147483648, %v1397_v6  ;;  %vm1402_vm7 = vcmp.eq.f32.partialorder %v1397_v6, 0.0 }
 0x3d7   :  { %2087 = vmatpush3.msra.mxu0 %v2140_v8  ;;  %2090 = vmatprep.mubr.msk.f32.mxu0 %vm1312_vm15, %v1579_v35 }
 0x3d8   :  { %2088 = vmatprep.subr.mxu0 %v2141_v1 }
 0x3d9   :  { %2089 = vmatpush3.msra.mxu0 %v2141_v1 }
 0x3da   :  { %2091 = vmatmul.mubr.msk.f32.vlgmr.msra.gmra.mxu0 %vm1312_vm15, %v1580_v56 }
 0x3e3   :  { %v2133_v44 = vpop.eup %2132 }
 0x3e4   :  { %v1399_v24 = vmul.f32 %v2133_v44, %v1397_v6 }
 0x3e6   :  { %v1401_v38 = vsel %vm1400_vm6, %v1397_v6, %v1399_v24 }
 0x3e7   :  { %v1404_v42 = vsel %vm1402_vm7, %v1403_v58, %v1401_v38 }
 0x3e8   :  { %v1481_v43 = vmul.f32 %v1404_v42, %v2721_v50  ;;  %v1482_v45 = vmul.f32 %v1404_v42, %v2726_v16 }
 0x3ea   :  { %2083 = vmatprep.mubr.f32.mxu1 %v1481_v43 }
 0x3eb   :  { %2084 = vmatmul.mubr.f32.vlgmr.msra.gmra.mxu1 %v1482_v45 }
 0x496   :  { %v1472_v53 = vpop.f32.mrf.mxu0 }
 0x497   :  { %v1476_v26 = vadd.f32 %v1472_v53, %v1405_v49 }
 0x498   :  { %v2050_v27 = vpop.f32.mrf.mxu0 }
 0x499   :  { %1478 = vst.msk [vmem:[#allocation2] sm:$0x1] %vm43_vm3, %v1476_v26 }
 0x49a   :  { %v2092_v2 = vpop.f32.mrf.mxu0 }
 0x49c   :  { %v1653_v59 = vpop.f32.mrf.mxu0 }
 0x4a0   :  { %v1565_v51 = vld [vmem:[#allocation2] sm:$0x1] }
 0x4a1   :  { %vm1566_vm15 = vcmp.le.f32.partialorder %v1565_v51, 0.0 }
 0x4a2   :  { %v1567_v54 = vsel %vm1566_vm15, 1.0, %v1565_v51 }
 0x4a3   :  { %2134 = vrsqrt.f32 %v1567_v54 }
 0x4ab   :  { %v2085_v61 = vpop.f32.mrf.mxu1 }
 0x4ac   :  { %v1559_v62 = vadd.f32 %v2085_v61, %v1480_v57 }
 0x4ad   :  { %v1549_v63 = vpop.f32.mrf.mxu1 }
 0x4ae   :  { %1561 = vst.msk [vmem:[#allocation3 + $0x8] sm:$0xff] %vm45_vm0, %v1559_v62  ;;  %v1558_v50 = vadd.f32 %v1549_v63, %v1479_v41 }
 0x4b0   :  { %1560 = vst.msk [vmem:[#allocation3] sm:$0xff] %vm45_vm0, %v1558_v50  ;;  %v2135_v16 = vpop.eup %2134 }
 0x4b1   :  { %v1575_v0 = vrot.slane %v2135_v16, %v2334_v18  ;;  %v1705_v18 = vld [vmem:[%s2866_s10] sm:$0xff] }
 0x4b5   :  { %v1570_v3 = vld [vmem:[#allocation3 + $0x8] sm:$0xff] }
 0x4b6   :  { %v1578_v5 = vmul.f32 %v1575_v0, %v1570_v3 }
 0x4b7   :  { %v1569_v48 = vld [vmem:[#allocation3] sm:$0xff] }
 0x4b8   :  { %v1663_v46 = vadd.f32 %v2092_v2, %v1578_v5  ;;  %v1577_v40 = vmul.f32 %v1575_v0, %v1569_v48 }
 0x4ba   :  { %v1662_v7 = vadd.f32 %v1653_v59, %v1577_v40  ;;  %v1667_v21 = vsel %vm45_vm0, %v1663_v46, 0.0 }
 0x4bb   :  { %1668 = vadd.xlane.f32.xlu1 %v1667_v21 }
 0x4bc   :  { %v1664_v52 = vsel %vm45_vm0, %v1662_v7, 0.0 }
 0x4bd   :  { %1665 = vadd.xlane.f32.xlu0 %v1664_v52 }
 0x4cc   :  { %1695 = vperm.xlu1 %2099, %v1691_v9  }
 0x4d0   :  { %1709 = vperm.xlu1 %2099, %v1705_v18  }
 0x4d4   :  { %1714 = vperm.xlu1 %2099, %v1706_v10  }
 0x544   :  { %v1669_v39 = vpop.xlane.xlu1 %1668 }
 0x545   :  { %v1672_v11 = vmul.f32 0.125, %v1669_v39 }
 0x546   :  { %v1666_v8 = vpop.xlane.xlu0 %1665 }
 0x547   :  { %v1674_v13 = vsub.f32 %v1663_v46, %v1672_v11  ;;  %v1671_v25 = vmul.f32 0.125, %v1666_v8 }
 0x548   :  { %v1696_v22 = vpop.permute.xlu1 %1695 }
 0x549   :  { %v1673_v37 = vsub.f32 %v1662_v7, %v1671_v25  ;;  %v1676_v23 = vmul.f32 %v1674_v13, %v1674_v13 }
 0x54b   :  { %v1680_v36 = vsel %vm45_vm0, %v1676_v23, 0.0  ;;  %v1675_v14 = vmul.f32 %v1673_v37, %v1673_v37 }
 0x54c   :  { %1681 = vadd.xlane.f32.xlu0 %v1680_v36  ;;  %v1710_v4 = vpop.permute.xlu1 %1709 }
 0x54d   :  { %v1677_v47 = vsel %vm45_vm0, %v1675_v14, 0.0 }
 0x550   :  { %1678 = vadd.xlane.f32.xlu0 %v1677_v47  ;;  %v1715_v33 = vpop.permute.xlu1 %1714 }
 0x566   :  { %1700 = vperm.xlu0 %2098, %v1692_v19  }
 0x5d5   :  { %v1682_v55 = vpop.xlane.xlu0 %1681 }
 0x5d6   :  { %v1684_v15 = vmul.f32 0.125, %v1682_v55 }
 0x5d8   :  { %v1686_v17 = vadd.f32 1e-05, %v1684_v15 }
 0x5d9   :  { %v1679_v20 = vpop.xlane.xlu0 %1678 }
 0x5da   :  { %2136 = vrsqrt.f32 %v1686_v17  ;;  %v1683_v60 = vmul.f32 0.125, %v1679_v20 }
 0x5dc   :  { %v1685_v12 = vadd.f32 1e-05, %v1683_v60 }
 0x5de   :  { %2138 = vrsqrt.f32 %v1685_v12 }
 0x5e1   :  { %v1701_v30 = vpop.permute.xlu0 %1700 }
 0x5e7   :  { %v2137_v28 = vpop.eup %2136 }
 0x5e8   :  { %v1690_v29 = vmul.f32 %v2137_v28, %v1674_v13 }
 0x5ea   :  { %v1704_v31 = vmul.f32 %v1701_v30, %v1690_v29 }
 0x5eb   :  { %v2139_v32 = vpop.eup %2138 }
 0x5ec   :  { %v1689_v34 = vmul.f32 %v2139_v32, %v1673_v37  ;;  %v1718_v6 = vadd.f32 %v1715_v33, %v1704_v31 }
 0x5ee   :  { %v1703_v35 = vmul.f32 %v1696_v22, %v1689_v34  ;;  %1720 = vst.msk [vmem:[%s2867_s11 + $0x8] sm:$0xff] %vm45_vm0, %v1718_v6 }
 0x5f0   :  { %v1717_v56 = vadd.f32 %v1710_v4, %v1703_v35 }
 0x5f2   :  { %1719 = vst.msk [vmem:[%s2867_s11] sm:$0xff] %vm45_vm0, %v1717_v56 }

</bundles_post_ra>
